<compile_context>
chip_gen: v5e
topology: v5e:2x2
jax: 0.10.0
libtpu: 0.0.40
codegen_flags: <defaults>
</compile_context>

<pallas_src>
import functools

import jax
import jax.numpy as jnp
from jax.experimental import pallas as pl
from jax.experimental.pallas import tpu as pltpu

FEAT = 28 * 28          # 784

# Original 8 Linear layers: (in_features, out_features) + following activation.
LAYER_DIMS = [
    (FEAT, 128), (128, 64), (64, 12), (12, 3),        # encoder
    (3, 12), (12, 64), (64, 128), (128, FEAT),        # decoder
]
LAYER_ACT = ["relu", "relu", "relu", "none",
             "relu", "relu", "relu", "sigmoid"]

# After fusing layer 3 (12->3, no act) with layer 4 (3->12):
FUSED_DIMS = [(FEAT, 128), (128, 64), (64, 12), (12, 12),
              (12, 64), (64, 128), (128, FEAT)]
FUSED_ACT = ["relu", "relu", "relu", "relu", "relu", "relu", "sigmoid"]


def autoencoder_kernel(x_ref, *refs):
    """One batch tile: full fused MLP, weights resident in VMEM.

    refs = (w0, b0, w1, b1, ..., w6, b6, out_ref)
    x_ref is the raw f32 input tile; it is cast to bf16 in-kernel (free VPU
    work hidden under the DMA).  Matmuls run bf16 x bf16 on the MXU with f32
    accumulation; bias add + ReLU (VPU) and sigmoid (EUP) in f32; activations
    carried as bf16 between layers.
    """
    out_ref = refs[-1]
    params = refs[:-1]

    h = x_ref[...].astype(jnp.bfloat16)              # (TB, 784) bf16
    n_layers = len(FUSED_ACT)
    for i, act in enumerate(FUSED_ACT):
        w = params[2 * i][...]                       # (in, out) bf16
        b = params[2 * i + 1][...]                   # (1, out)  f32
        y = jnp.dot(h, w, preferred_element_type=jnp.float32) + b
        if act == "relu":
            y = jnp.maximum(y, 0.0)
        else:                                        # "sigmoid"
            y = jax.nn.sigmoid(y)
        h = y.astype(jnp.bfloat16) if i + 1 < n_layers else y
    out_ref[...] = h.astype(out_ref.dtype)


def _round_up(n, m):
    return (n + m - 1) // m * m


def prepare_params(params):
    """Fuse the 12->3->12 pair and cast weights to bf16 (biases stay f32).

    params: flat list [w0, b0, ..., w7, b7] with w_i of shape (in, out) and
            b_i of shape (1, out) (PyTorch layout, pre-transposed).
    Returns the flat list [W0, B0, ..., W6, B6] consumed by the kernel.
    """
    ws = list(params[0::2])
    bs = list(params[1::2])

    # Exact algebraic fusion: no nonlinearity between layers 3 and 4.
    w34 = ws[3] @ ws[4]                       # (12, 12)
    b34 = bs[3] @ ws[4] + bs[4]               # (1, 12)
    ws = [ws[0], ws[1], ws[2], w34, ws[5], ws[6], ws[7]]
    bs = [bs[0], bs[1], bs[2], b34, bs[5], bs[6], bs[7]]

    prepped = []
    for w, b in zip(ws, bs):
        prepped += [w.astype(jnp.bfloat16), b.astype(jnp.float32)]
    return prepped


def _choose_tile(batch, block_b):
    """Batch tile: multiple of 16 (bf16 sublane pack), <= block_b, and split
    once so v7x's two TensorCores both get work when the batch is large."""
    tb = min(block_b, _round_up(batch, 16))
    if _round_up(batch, tb) == tb and tb >= 1024:
        tb = _round_up(tb // 2, 16)
    return tb


@functools.partial(jax.jit, static_argnames=("block_b",))
def autoencoder_forward(x, prepped, *, block_b=1024):
    """x: (B, 784) f32.  prepped: output of prepare_params().  Returns (B, 784) f32."""
    batch = x.shape[0]
    tb = _choose_tile(batch, block_b)
    batch_p = _round_up(batch, tb)
    x_p = x if batch_p == batch else jnp.pad(x, ((0, batch_p - batch), (0, 0)))

    # Batch-tiled x / out (feature dim kept at 784 == full array, lane-masked
    # only on the 16-wide tail column group); weights & biases use constant
    # index maps so they are fetched once and stay VMEM-resident.
    x_spec = pl.BlockSpec((tb, FEAT), lambda i: (i, 0))
    out_spec = pl.BlockSpec((tb, FEAT), lambda i: (i, 0))
    param_specs = []
    for (f_in, f_out) in FUSED_DIMS:
        param_specs.append(pl.BlockSpec((f_in, f_out), lambda i: (0, 0)))
        param_specs.append(pl.BlockSpec((1, f_out), lambda i: (0, 0)))

    # Advisory cost estimate for XLA's scheduler.
    flops = 2 * batch_p * sum(fi * fo for fi, fo in FUSED_DIMS)
    transcendentals = batch_p * FEAT   # final sigmoid
    bytes_accessed = (batch_p * FEAT * 4                       # x f32 in
                      + batch_p * FEAT * 4                     # out f32
                      + sum(fi * fo * 2 + fo * 4 for fi, fo in FUSED_DIMS))
    cost = pl.CostEstimate(flops=flops,
                           transcendentals=transcendentals,
                           bytes_accessed=bytes_accessed)

    out = pl.pallas_call(
        autoencoder_kernel,
        out_shape=jax.ShapeDtypeStruct((batch_p, FEAT), jnp.float32),
        grid_spec=pltpu.PrefetchScalarGridSpec(
            num_scalar_prefetch=0,
            grid=(batch_p // tb,),
            in_specs=[x_spec] + param_specs,
            out_specs=out_spec,
        ),
        compiler_params=pltpu.CompilerParams(
            dimension_semantics=("parallel",),
            vmem_limit_bytes=48 << 20,
        ),
        cost_estimate=cost,
    )(x_p, *prepped)

    return out if batch_p == batch else out[:batch]


def init_params(key):
    """Deterministic init mimicking nn.Linear's U(-1/sqrt(in), 1/sqrt(in))."""
    params = []
    for (fan_in, fan_out) in LAYER_DIMS:
        key, kw, kb = jax.random.split(key, 3)
        bound = 1.0 / jnp.sqrt(jnp.float32(fan_in))
        w = jax.random.uniform(kw, (fan_in, fan_out), jnp.float32,
                               minval=-bound, maxval=bound)
        b = jax.random.uniform(kb, (1, fan_out), jnp.float32,
                               minval=-bound, maxval=bound)
        params += [w, b]
    return params


def reference_forward_f32(x, params):
    """Pure-JAX f32 reference (matches the original PyTorch forward)."""
    h = x
    for i, act in enumerate(LAYER_ACT):
        h = h @ params[2 * i] + params[2 * i + 1]
        if act == "relu":
            h = jnp.maximum(h, 0.0)
        elif act == "sigmoid":
            h = jax.nn.sigmoid(h)
    return h


def reference_forward_prepped(x, prepped):
    """Pure-JAX reference following the kernel's bf16/fused numeric path."""
    h = x.astype(jnp.bfloat16)
    n_layers = len(FUSED_ACT)
    for i, act in enumerate(FUSED_ACT):
        y = jnp.dot(h, prepped[2 * i], preferred_element_type=jnp.float32)
        y = y + prepped[2 * i + 1]
        y = jnp.maximum(y, 0.0) if act == "relu" else jax.nn.sigmoid(y)
        h = y.astype(jnp.bfloat16) if i + 1 < n_layers else y
    return h


if __name__ == "__main__":
    key = jax.random.PRNGKey(0)
    key, kx = jax.random.split(key)

    batch = 16
    x = jax.random.uniform(kx, (batch, FEAT), jnp.float32)   # MNIST-like flat input
    params = init_params(key)
    prepped = prepare_params(params)

    out = autoencoder_forward(x, prepped)
    out = jax.block_until_ready(out)
    assert out.shape == (batch, FEAT), out.shape

    # Tight check against a reference that follows the same bf16/fused path.
    ref_bf16 = reference_forward_prepped(x, prepped)
    assert jnp.allclose(out, ref_bf16, atol=2e-3, rtol=2e-3), \
        "mismatch vs bf16-path reference"

    # Loose check against the exact f32 PyTorch-equivalent forward
    # (bf16 cast + layer fusion differ only at rounding level).
    ref_f32 = reference_forward_f32(x, params)
    assert jnp.allclose(out, ref_f32, atol=3e-2, rtol=3e-2), \
        "mismatch vs f32 reference"

    print("KERNEL_OK")
</pallas_src>

<mosaic_0001>
module attributes {stable_mosaic.version = 11 : i64} {
  func.func @autoencoder_kernel(%arg0: i32, %arg1: memref<16x784xf32, #tpu.memory_space<vmem>>, %arg2: memref<784x128xbf16, #tpu.memory_space<vmem>>, %arg3: memref<1x128xf32, #tpu.memory_space<vmem>>, %arg4: memref<128x64xbf16, #tpu.memory_space<vmem>>, %arg5: memref<1x64xf32, #tpu.memory_space<vmem>>, %arg6: memref<64x12xbf16, #tpu.memory_space<vmem>>, %arg7: memref<1x12xf32, #tpu.memory_space<vmem>>, %arg8: memref<12x12xbf16, #tpu.memory_space<vmem>>, %arg9: memref<1x12xf32, #tpu.memory_space<vmem>>, %arg10: memref<12x64xbf16, #tpu.memory_space<vmem>>, %arg11: memref<1x64xf32, #tpu.memory_space<vmem>>, %arg12: memref<64x128xbf16, #tpu.memory_space<vmem>>, %arg13: memref<1x128xf32, #tpu.memory_space<vmem>>, %arg14: memref<128x784xbf16, #tpu.memory_space<vmem>>, %arg15: memref<1x784xf32, #tpu.memory_space<vmem>>, %arg16: memref<16x784xf32, #tpu.memory_space<vmem>>) attributes {dimension_semantics = [#tpu.dimension_semantics<parallel>], iteration_bounds = array<i64: 1>, scalar_prefetch = 0 : i64, scratch_operands = 0 : i64, tpu.core_type = #tpu.core_type<tc>, window_params = [{transform_indices = @transform_0, window_bounds = array<i64: 16, 784>}, {pipeline_mode = #tpu.pipeline_mode<synchronous>, transform_indices = @transform_1, window_bounds = array<i64: 784, 128>}, {pipeline_mode = #tpu.pipeline_mode<synchronous>, transform_indices = @transform_2, window_bounds = array<i64: 1, 128>}, {pipeline_mode = #tpu.pipeline_mode<synchronous>, transform_indices = @transform_3, window_bounds = array<i64: 128, 64>}, {pipeline_mode = #tpu.pipeline_mode<synchronous>, transform_indices = @transform_4, window_bounds = array<i64: 1, 64>}, {pipeline_mode = #tpu.pipeline_mode<synchronous>, transform_indices = @transform_5, window_bounds = array<i64: 64, 12>}, {pipeline_mode = #tpu.pipeline_mode<synchronous>, transform_indices = @transform_6, window_bounds = array<i64: 1, 12>}, {pipeline_mode = #tpu.pipeline_mode<synchronous>, transform_indices = @transform_7, window_bounds = array<i64: 12, 12>}, {pipeline_mode = #tpu.pipeline_mode<synchronous>, transform_indices = @transform_8, window_bounds = array<i64: 1, 12>}, {pipeline_mode = #tpu.pipeline_mode<synchronous>, transform_indices = @transform_9, window_bounds = array<i64: 12, 64>}, {pipeline_mode = #tpu.pipeline_mode<synchronous>, transform_indices = @transform_10, window_bounds = array<i64: 1, 64>}, {pipeline_mode = #tpu.pipeline_mode<synchronous>, transform_indices = @transform_11, window_bounds = array<i64: 64, 128>}, {pipeline_mode = #tpu.pipeline_mode<synchronous>, transform_indices = @transform_12, window_bounds = array<i64: 1, 128>}, {pipeline_mode = #tpu.pipeline_mode<synchronous>, transform_indices = @transform_13, window_bounds = array<i64: 128, 784>}, {pipeline_mode = #tpu.pipeline_mode<synchronous>, transform_indices = @transform_14, window_bounds = array<i64: 1, 784>}, {transform_indices = @transform_15, window_bounds = array<i64: 16, 784>}]} {
    %c0 = arith.constant 0 : index
    %c0_0 = arith.constant 0 : index
    %0 = vector.load %arg1[%c0, %c0_0] : memref<16x784xf32, #tpu.memory_space<vmem>>, vector<16x784xf32>
    %1 = arith.truncf %0 : vector<16x784xf32> to vector<16x784xbf16>
    %c0_1 = arith.constant 0 : index
    %c0_2 = arith.constant 0 : index
    %2 = vector.load %arg2[%c0_1, %c0_2] : memref<784x128xbf16, #tpu.memory_space<vmem>>, vector<784x128xbf16>
    %c0_3 = arith.constant 0 : index
    %c0_4 = arith.constant 0 : index
    %3 = vector.load %arg3[%c0_3, %c0_4] : memref<1x128xf32, #tpu.memory_space<vmem>>, vector<1x128xf32>
    %cst = arith.constant dense<0.000000e+00> : vector<16x128xf32>
    %4 = tpu.matmul %1, %2, %cst {dimension_numbers = #tpu.dot_dimension_numbers<[1], [0], [0], [1], [0, 0, 1, 1], [], []>} : vector<16x784xbf16>, vector<784x128xbf16>, vector<16x128xf32> -> vector<16x128xf32>
    %5 = vector.broadcast %3 : vector<1x128xf32> to vector<16x128xf32>
    %6 = arith.addf %4, %5 : vector<16x128xf32>
    %cst_5 = arith.constant 0.000000e+00 : f32
    %7 = vector.broadcast %cst_5 : f32 to vector<16x128xf32>
    %8 = arith.maximumf %6, %7 : vector<16x128xf32>
    %9 = arith.truncf %8 : vector<16x128xf32> to vector<16x128xbf16>
    %c0_6 = arith.constant 0 : index
    %c0_7 = arith.constant 0 : index
    %10 = vector.load %arg4[%c0_6, %c0_7] : memref<128x64xbf16, #tpu.memory_space<vmem>>, vector<128x64xbf16>
    %c0_8 = arith.constant 0 : index
    %c0_9 = arith.constant 0 : index
    %11 = vector.load %arg5[%c0_8, %c0_9] : memref<1x64xf32, #tpu.memory_space<vmem>>, vector<1x64xf32>
    %cst_10 = arith.constant dense<0.000000e+00> : vector<16x64xf32>
    %12 = tpu.matmul %9, %10, %cst_10 {dimension_numbers = #tpu.dot_dimension_numbers<[1], [0], [0], [1], [0, 0, 1, 1], [], []>} : vector<16x128xbf16>, vector<128x64xbf16>, vector<16x64xf32> -> vector<16x64xf32>
    %13 = vector.broadcast %11 : vector<1x64xf32> to vector<16x64xf32>
    %14 = arith.addf %12, %13 : vector<16x64xf32>
    %cst_11 = arith.constant 0.000000e+00 : f32
    %15 = vector.broadcast %cst_11 : f32 to vector<16x64xf32>
    %16 = arith.maximumf %14, %15 : vector<16x64xf32>
    %17 = arith.truncf %16 : vector<16x64xf32> to vector<16x64xbf16>
    %c0_12 = arith.constant 0 : index
    %c0_13 = arith.constant 0 : index
    %18 = vector.load %arg6[%c0_12, %c0_13] : memref<64x12xbf16, #tpu.memory_space<vmem>>, vector<64x12xbf16>
    %c0_14 = arith.constant 0 : index
    %c0_15 = arith.constant 0 : index
    %19 = vector.load %arg7[%c0_14, %c0_15] : memref<1x12xf32, #tpu.memory_space<vmem>>, vector<1x12xf32>
    %cst_16 = arith.constant dense<0.000000e+00> : vector<16x12xf32>
    %20 = tpu.matmul %17, %18, %cst_16 {dimension_numbers = #tpu.dot_dimension_numbers<[1], [0], [0], [1], [0, 0, 1, 1], [], []>} : vector<16x64xbf16>, vector<64x12xbf16>, vector<16x12xf32> -> vector<16x12xf32>
    %21 = vector.broadcast %19 : vector<1x12xf32> to vector<16x12xf32>
    %22 = arith.addf %20, %21 : vector<16x12xf32>
    %cst_17 = arith.constant 0.000000e+00 : f32
    %23 = vector.broadcast %cst_17 : f32 to vector<16x12xf32>
    %24 = arith.maximumf %22, %23 : vector<16x12xf32>
    %25 = arith.truncf %24 : vector<16x12xf32> to vector<16x12xbf16>
    %c0_18 = arith.constant 0 : index
    %c0_19 = arith.constant 0 : index
    %26 = vector.load %arg8[%c0_18, %c0_19] : memref<12x12xbf16, #tpu.memory_space<vmem>>, vector<12x12xbf16>
    %c0_20 = arith.constant 0 : index
    %c0_21 = arith.constant 0 : index
    %27 = vector.load %arg9[%c0_20, %c0_21] : memref<1x12xf32, #tpu.memory_space<vmem>>, vector<1x12xf32>
    %cst_22 = arith.constant dense<0.000000e+00> : vector<16x12xf32>
    %28 = tpu.matmul %25, %26, %cst_22 {dimension_numbers = #tpu.dot_dimension_numbers<[1], [0], [0], [1], [0, 0, 1, 1], [], []>} : vector<16x12xbf16>, vector<12x12xbf16>, vector<16x12xf32> -> vector<16x12xf32>
    %29 = vector.broadcast %27 : vector<1x12xf32> to vector<16x12xf32>
    %30 = arith.addf %28, %29 : vector<16x12xf32>
    %cst_23 = arith.constant 0.000000e+00 : f32
    %31 = vector.broadcast %cst_23 : f32 to vector<16x12xf32>
    %32 = arith.maximumf %30, %31 : vector<16x12xf32>
    %33 = arith.truncf %32 : vector<16x12xf32> to vector<16x12xbf16>
    %c0_24 = arith.constant 0 : index
    %c0_25 = arith.constant 0 : index
    %34 = vector.load %arg10[%c0_24, %c0_25] : memref<12x64xbf16, #tpu.memory_space<vmem>>, vector<12x64xbf16>
    %c0_26 = arith.constant 0 : index
    %c0_27 = arith.constant 0 : index
    %35 = vector.load %arg11[%c0_26, %c0_27] : memref<1x64xf32, #tpu.memory_space<vmem>>, vector<1x64xf32>
    %cst_28 = arith.constant dense<0.000000e+00> : vector<16x64xf32>
    %36 = tpu.matmul %33, %34, %cst_28 {dimension_numbers = #tpu.dot_dimension_numbers<[1], [0], [0], [1], [0, 0, 1, 1], [], []>} : vector<16x12xbf16>, vector<12x64xbf16>, vector<16x64xf32> -> vector<16x64xf32>
    %37 = vector.broadcast %35 : vector<1x64xf32> to vector<16x64xf32>
    %38 = arith.addf %36, %37 : vector<16x64xf32>
    %cst_29 = arith.constant 0.000000e+00 : f32
    %39 = vector.broadcast %cst_29 : f32 to vector<16x64xf32>
    %40 = arith.maximumf %38, %39 : vector<16x64xf32>
    %41 = arith.truncf %40 : vector<16x64xf32> to vector<16x64xbf16>
    %c0_30 = arith.constant 0 : index
    %c0_31 = arith.constant 0 : index
    %42 = vector.load %arg12[%c0_30, %c0_31] : memref<64x128xbf16, #tpu.memory_space<vmem>>, vector<64x128xbf16>
    %c0_32 = arith.constant 0 : index
    %c0_33 = arith.constant 0 : index
    %43 = vector.load %arg13[%c0_32, %c0_33] : memref<1x128xf32, #tpu.memory_space<vmem>>, vector<1x128xf32>
    %cst_34 = arith.constant dense<0.000000e+00> : vector<16x128xf32>
    %44 = tpu.matmul %41, %42, %cst_34 {dimension_numbers = #tpu.dot_dimension_numbers<[1], [0], [0], [1], [0, 0, 1, 1], [], []>} : vector<16x64xbf16>, vector<64x128xbf16>, vector<16x128xf32> -> vector<16x128xf32>
    %45 = vector.broadcast %43 : vector<1x128xf32> to vector<16x128xf32>
    %46 = arith.addf %44, %45 : vector<16x128xf32>
    %cst_35 = arith.constant 0.000000e+00 : f32
    %47 = vector.broadcast %cst_35 : f32 to vector<16x128xf32>
    %48 = arith.maximumf %46, %47 : vector<16x128xf32>
    %49 = arith.truncf %48 : vector<16x128xf32> to vector<16x128xbf16>
    %c0_36 = arith.constant 0 : index
    %c0_37 = arith.constant 0 : index
    %50 = vector.load %arg14[%c0_36, %c0_37] : memref<128x784xbf16, #tpu.memory_space<vmem>>, vector<128x784xbf16>
    %c0_38 = arith.constant 0 : index
    %c0_39 = arith.constant 0 : index
    %51 = vector.load %arg15[%c0_38, %c0_39] : memref<1x784xf32, #tpu.memory_space<vmem>>, vector<1x784xf32>
    %cst_40 = arith.constant dense<0.000000e+00> : vector<16x784xf32>
    %52 = tpu.matmul %49, %50, %cst_40 {dimension_numbers = #tpu.dot_dimension_numbers<[1], [0], [0], [1], [0, 0, 1, 1], [], []>} : vector<16x128xbf16>, vector<128x784xbf16>, vector<16x784xf32> -> vector<16x784xf32>
    %53 = vector.broadcast %51 : vector<1x784xf32> to vector<16x784xf32>
    %54 = arith.addf %52, %53 : vector<16x784xf32>
    %55 = arith.negf %54 : vector<16x784xf32>
    %56 = math.exp %55 : vector<16x784xf32>
    %cst_41 = arith.constant 1.000000e+00 : f32
    %57 = vector.broadcast %cst_41 : f32 to vector<16x784xf32>
    %58 = arith.addf %57, %56 : vector<16x784xf32>
    %59 = arith.divf %57, %58 : vector<16x784xf32>
    %c0_42 = arith.constant 0 : index
    %c0_43 = arith.constant 0 : index
    %60 = vector.load %arg16[%c0_42, %c0_43] : memref<16x784xf32, #tpu.memory_space<vmem>>, vector<16x784xf32>
    tpu.vector_store %arg16[%c0_42, %c0_43], %59 {strides = array<i32>} : memref<16x784xf32, #tpu.memory_space<vmem>>, vector<16x784xf32>,
    return
  }
  func.func @transform_0(%arg0: i32) -> (i32, i32) {
    %c0_i32 = arith.constant 0 : i32
    %c0_i32_0 = arith.constant 0 : i32
    return %arg0, %c0_i32 : i32, i32
  }
  func.func @transform_1(%arg0: i32) -> (i32, i32) {
    %c0_i32 = arith.constant 0 : i32
    %c0_i32_0 = arith.constant 0 : i32
    %c0_i32_1 = arith.constant 0 : i32
    return %c0_i32, %c0_i32_0 : i32, i32
  }
  func.func @transform_2(%arg0: i32) -> (i32, i32) {
    %c0_i32 = arith.constant 0 : i32
    %c0_i32_0 = arith.constant 0 : i32
    %c0_i32_1 = arith.constant 0 : i32
    return %c0_i32, %c0_i32_0 : i32, i32
  }
  func.func @transform_3(%arg0: i32) -> (i32, i32) {
    %c0_i32 = arith.constant 0 : i32
    %c0_i32_0 = arith.constant 0 : i32
    %c0_i32_1 = arith.constant 0 : i32
    return %c0_i32, %c0_i32_0 : i32, i32
  }
  func.func @transform_4(%arg0: i32) -> (i32, i32) {
    %c0_i32 = arith.constant 0 : i32
    %c0_i32_0 = arith.constant 0 : i32
    %c0_i32_1 = arith.constant 0 : i32
    return %c0_i32, %c0_i32_0 : i32, i32
  }
  func.func @transform_5(%arg0: i32) -> (i32, i32) {
    %c0_i32 = arith.constant 0 : i32
    %c0_i32_0 = arith.constant 0 : i32
    %c0_i32_1 = arith.constant 0 : i32
    return %c0_i32, %c0_i32_0 : i32, i32
  }
  func.func @transform_6(%arg0: i32) -> (i32, i32) {
    %c0_i32 = arith.constant 0 : i32
    %c0_i32_0 = arith.constant 0 : i32
    %c0_i32_1 = arith.constant 0 : i32
    return %c0_i32, %c0_i32_0 : i32, i32
  }
  func.func @transform_7(%arg0: i32) -> (i32, i32) {
    %c0_i32 = arith.constant 0 : i32
    %c0_i32_0 = arith.constant 0 : i32
    %c0_i32_1 = arith.constant 0 : i32
    return %c0_i32, %c0_i32_0 : i32, i32
  }
  func.func @transform_8(%arg0: i32) -> (i32, i32) {
    %c0_i32 = arith.constant 0 : i32
    %c0_i32_0 = arith.constant 0 : i32
    %c0_i32_1 = arith.constant 0 : i32
    return %c0_i32, %c0_i32_0 : i32, i32
  }
  func.func @transform_9(%arg0: i32) -> (i32, i32) {
    %c0_i32 = arith.constant 0 : i32
    %c0_i32_0 = arith.constant 0 : i32
    %c0_i32_1 = arith.constant 0 : i32
    return %c0_i32, %c0_i32_0 : i32, i32
  }
  func.func @transform_10(%arg0: i32) -> (i32, i32) {
    %c0_i32 = arith.constant 0 : i32
    %c0_i32_0 = arith.constant 0 : i32
    %c0_i32_1 = arith.constant 0 : i32
    return %c0_i32, %c0_i32_0 : i32, i32
  }
  func.func @transform_11(%arg0: i32) -> (i32, i32) {
    %c0_i32 = arith.constant 0 : i32
    %c0_i32_0 = arith.constant 0 : i32
    %c0_i32_1 = arith.constant 0 : i32
    return %c0_i32, %c0_i32_0 : i32, i32
  }
  func.func @transform_12(%arg0: i32) -> (i32, i32) {
    %c0_i32 = arith.constant 0 : i32
    %c0_i32_0 = arith.constant 0 : i32
    %c0_i32_1 = arith.constant 0 : i32
    return %c0_i32, %c0_i32_0 : i32, i32
  }
  func.func @transform_13(%arg0: i32) -> (i32, i32) {
    %c0_i32 = arith.constant 0 : i32
    %c0_i32_0 = arith.constant 0 : i32
    %c0_i32_1 = arith.constant 0 : i32
    return %c0_i32, %c0_i32_0 : i32, i32
  }
  func.func @transform_14(%arg0: i32) -> (i32, i32) {
    %c0_i32 = arith.constant 0 : i32
    %c0_i32_0 = arith.constant 0 : i32
    %c0_i32_1 = arith.constant 0 : i32
    return %c0_i32, %c0_i32_0 : i32, i32
  }
  func.func @transform_15(%arg0: i32) -> (i32, i32) {
    %c0_i32 = arith.constant 0 : i32
    %c0_i32_0 = arith.constant 0 : i32
    return %arg0, %c0_i32 : i32, i32
  }
}

</mosaic_0001>

<bundles_post_ra>
// kernel: autoencoder_forward.1
= control target key start
LH: loop header
LB: loop body
LE: loop exit
PB: predicated region body
PF: predicated region fallthrough
CT: control target
= control target key end

     0   :  { %s3222_s0 = inlined_call_operand.vmem [shape: f32[16,784], index: 0, kind: input, shape index: {}]   ;;  %s3223_s1 = inlined_call_operand.vmem [shape: bf16[784,128], index: 1, kind: input, shape index: {}]   ;;  %s3224_s2 = inlined_call_operand.vmem [shape: f32[1,128], index: 2, kind: input, shape index: {}]   ;;  %s3225_s3 = inlined_call_operand.vmem [shape: bf16[128,64], index: 3, kind: input, shape index: {}]   ;;  %s3226_s4 = inlined_call_operand.vmem [shape: f32[1,64], index: 4, kind: input, shape index: {}]   ;;  %s3227_s5 = inlined_call_operand.vmem [shape: bf16[64,12], index: 5, kind: input, shape index: {}]   ;;  %s3228_s6 = inlined_call_operand.vmem [shape: f32[1,12], index: 6, kind: input, shape index: {}]   ;;  %s3229_s7 = inlined_call_operand.vmem [shape: bf16[12,12], index: 7, kind: input, shape index: {}]   ;;  %s3230_s8 = inlined_call_operand.vmem [shape: f32[1,12], index: 8, kind: input, shape index: {}]   ;;  %s3231_s9 = inlined_call_operand.vmem [shape: bf16[12,64], index: 9, kind: input, shape index: {}]   ;;  %s3232_s10 = inlined_call_operand.vmem [shape: f32[1,64], index: 10, kind: input, shape index: {}]   ;;  %s3233_s11 = inlined_call_operand.vmem [shape: bf16[64,128], index: 11, kind: input, shape index: {}]   ;;  %s3234_s12 = inlined_call_operand.vmem [shape: f32[1,128], index: 12, kind: input, shape index: {}]   ;;  %s3235_s13 = inlined_call_operand.vmem [shape: bf16[128,784], index: 13, kind: input, shape index: {}]   ;;  %s3236_s14 = inlined_call_operand.vmem [shape: f32[1,784], index: 14, kind: input, shape index: {}]   ;;  %s3237_s15 = inlined_call_operand.hbm [shape: f32[16,784], index: 15, kind: output, shape index: {}]  }
   0x1   :  { %v2124_v0 = vld [vmem:[%s3223_s1 + $0x38] sm:$0xff]  ;;  %v2123_v4 = vld [vmem:[%s3223_s1 + $0x30] sm:$0xff]  ;;  %v2122_v8 = vld [vmem:[%s3223_s1 + $0x28] sm:$0xff] }
   0x2   :  { %v2132_v1 = vld [vmem:[%s3223_s1 + $0x78] sm:$0xff]  ;;  %473 = vmatpush.bf16.msra.mxu0 %v2124_v0  ;;  %v2131_v5 = vld [vmem:[%s3223_s1 + $0x70] sm:$0xff]  ;;  %v2130_v9 = vld [vmem:[%s3223_s1 + $0x68] sm:$0xff] }
   0x3   :  { %v2140_v2 = vld [vmem:[%s3223_s1 + $0xb8] sm:$0xff]  ;;  %487 = vmatpush.bf16.msra.mxu1 %v2132_v1  ;;  %v2139_v6 = vld [vmem:[%s3223_s1 + $0xb0] sm:$0xff]  ;;  %v2138_v10 = vld [vmem:[%s3223_s1 + $0xa8] sm:$0xff] }
   0x4   :  { %v2148_v3 = vld [vmem:[%s3223_s1 + $0xf8] sm:$0xff]  ;;  %501 = vmatpush.bf16.msra.mxu2 %v2140_v2  ;;  %v2147_v7 = vld [vmem:[%s3223_s1 + $0xf0] sm:$0xff]  ;;  %v2146_v11 = vld [vmem:[%s3223_s1 + $0xe8] sm:$0xff] }
   0x5   :  { %515 = vmatpush.bf16.msra.mxu3 %v2148_v3  ;;  %v2121_v12 = vld [vmem:[%s3223_s1 + $0x20] sm:$0xff]  ;;  %v2120_v16 = vld [vmem:[%s3223_s1 + $0x18] sm:$0xff]  ;;  %v2119_v20 = vld [vmem:[%s3223_s1 + $0x10] sm:$0xff] }
   0x6   :  { %474 = vmatpush.bf16.msra.mxu0 %v2123_v4  ;;  %v2129_v13 = vld [vmem:[%s3223_s1 + $0x60] sm:$0xff]  ;;  %v2128_v17 = vld [vmem:[%s3223_s1 + $0x58] sm:$0xff]  ;;  %v2127_v21 = vld [vmem:[%s3223_s1 + $0x50] sm:$0xff] }
   0x7   :  { %488 = vmatpush.bf16.msra.mxu1 %v2131_v5  ;;  %v2137_v14 = vld [vmem:[%s3223_s1 + $0xa0] sm:$0xff]  ;;  %v2136_v18 = vld [vmem:[%s3223_s1 + $0x98] sm:$0xff]  ;;  %v2135_v22 = vld [vmem:[%s3223_s1 + $0x90] sm:$0xff] }
   0x8   :  { %502 = vmatpush.bf16.msra.mxu2 %v2139_v6  ;;  %v2145_v15 = vld [vmem:[%s3223_s1 + $0xe0] sm:$0xff]  ;;  %v2144_v19 = vld [vmem:[%s3223_s1 + $0xd8] sm:$0xff]  ;;  %v2143_v23 = vld [vmem:[%s3223_s1 + $0xd0] sm:$0xff] }
   0x9   :  { %516 = vmatpush.bf16.msra.mxu3 %v2147_v7 }
   0xa   :  { %475 = vmatpush.bf16.msra.mxu0 %v2122_v8 }
   0xb   :  { %489 = vmatpush.bf16.msra.mxu1 %v2130_v9 }
   0xc   :  { %503 = vmatpush.bf16.msra.mxu2 %v2138_v10 }
   0xd   :  { %517 = vmatpush.bf16.msra.mxu3 %v2146_v11 }
   0xe   :  { %476 = vmatpush.bf16.msra.mxu0 %v2121_v12 }
   0xf   :  { %490 = vmatpush.bf16.msra.mxu1 %v2129_v13 }
  0x10   :  { %504 = vmatpush.bf16.msra.mxu2 %v2137_v14 }
  0x11   :  { %518 = vmatpush.bf16.msra.mxu3 %v2145_v15 }
  0x12   :  { %477 = vmatpush.bf16.msra.mxu0 %v2120_v16 }
  0x13   :  { %491 = vmatpush.bf16.msra.mxu1 %v2128_v17 }
  0x14   :  { %505 = vmatpush.bf16.msra.mxu2 %v2136_v18 }
  0x15   :  { %519 = vmatpush.bf16.msra.mxu3 %v2144_v19 }
  0x16   :  { %20 = vsyncpa [#allocation3], 0  ;;  %478 = vmatpush.bf16.msra.mxu0 %v2119_v20  ;;  %v2118_v24 = vld [vmem:[%s3223_s1 + $0x8] sm:$0xff]  ;;  %v2117_v28 = vld [vmem:[%s3223_s1] sm:$0xff]  ;;  %vm469_vm0 = vcmask 130048   ;;  %vm731_vm1 = vcmask 1045504  }
  0x17   :  { %492 = vmatpush.bf16.msra.mxu1 %v2127_v21  ;;  %v2126_v25 = vld [vmem:[%s3223_s1 + $0x48] sm:$0xff]  ;;  %v2125_v29 = vld [vmem:[%s3223_s1 + $0x40] sm:$0xff]  ;;  %v59_v31 = vld [vmem:[%s3222_s0 + $0x38] sm:$0xff]  ;;  %vm695_vm2 = vcmask 523264   ;;  %vm727_vm3 = vcmask 97280   ;;  %s2333_s24 = smov 56  }
  0x18   :  { %506 = vmatpush.bf16.msra.mxu2 %v2135_v22  ;;  %v2134_v26 = vld [vmem:[%s3223_s1 + $0x88] sm:$0xff]  ;;  %v52_v30 = vld [vmem:[%s3222_s0] sm:$0xff]  ;;  %v2156_v34 = vld [vmem:[%s3223_s1 + $0x138] sm:$0xff] }
  0x19   :  { %520 = vmatpush.bf16.msra.mxu3 %v2143_v23  ;;  %v2142_v27 = vld [vmem:[%s3223_s1 + $0xc8] sm:$0xff]  ;;  %v60_v33 = vld [vmem:[%s3222_s0 + $0x40] sm:$0xff]  ;;  %v2164_v35 = vld [vmem:[%s3223_s1 + $0x178] sm:$0xff]  ;;  %v66_v40 = vpack.c.bf16 %v59_v31, %v52_v30 }
  0x1a   :  { %479 = vmatpush.bf16.msra.mxu0 %v2118_v24  ;;  %v53_v32 = vld [vmem:[%s3222_s0 + $0x8] sm:$0xff]  ;;  %v2133_v36 = vld [vmem:[%s3223_s1 + $0x80] sm:$0xff]  ;;  %v54_v38 = vld [vmem:[%s3222_s0 + $0x10] sm:$0xff] }
  0x1b   :  { %493 = vmatpush.bf16.msra.mxu1 %v2126_v25  ;;  %v2141_v37 = vld [vmem:[%s3223_s1 + $0xc0] sm:$0xff]  ;;  %v61_v39 = vld [vmem:[%s3222_s0 + $0x48] sm:$0xff]  ;;  %v55_v41 = vld [vmem:[%s3222_s0 + $0x18] sm:$0xff]  ;;  %v67_v43 = vpack.c.bf16 %v60_v33, %v53_v32 }
  0x1c   :  { %507 = vmatpush.bf16.msra.mxu2 %v2134_v26  ;;  %v62_v42 = vld [vmem:[%s3222_s0 + $0x50] sm:$0xff]  ;;  %v2165_v44 = vld [vmem:[%s3223_s1 + $0x180] sm:$0xff]  ;;  %v68_v47 = vpack.c.bf16 %v61_v39, %v54_v38  ;;  %v2154_v49 = vld [vmem:[%s3223_s1 + $0x128] sm:$0xff] }
  0x1d   :  { %521 = vmatpush.bf16.msra.mxu3 %v2142_v27  ;;  %v2155_v45 = vld [vmem:[%s3223_s1 + $0x130] sm:$0xff]  ;;  %v69_v48 = vpack.c.bf16 %v62_v42, %v55_v41  ;;  %v2162_v50 = vld [vmem:[%s3223_s1 + $0x168] sm:$0xff]  ;;  %v2153_v51 = vld [vmem:[%s3223_s1 + $0x120] sm:$0xff] }
  0x1e   :  { %480 = vmatpush.bf16.msra.mxu0 %v2117_v28  ;;  %v2163_v46 = vld [vmem:[%s3223_s1 + $0x170] sm:$0xff]  ;;  %v2161_v52 = vld [vmem:[%s3223_s1 + $0x160] sm:$0xff]  ;;  %v2152_v53 = vld [vmem:[%s3223_s1 + $0x118] sm:$0xff] }
  0x1f   :  { %494 = vmatpush.bf16.msra.mxu1 %v2125_v29  ;;  %v2160_v54 = vld [vmem:[%s3223_s1 + $0x158] sm:$0xff]  ;;  %v58_v55 = vld [vmem:[%s3222_s0 + $0x30] sm:$0xff]  ;;  %v65_v56 = vld [vmem:[%s3222_s0 + $0x68] sm:$0xff] }
  0x20   :  { %508 = vmatpush.bf16.msra.mxu2 %v2133_v36  ;;  %v2151_v57 = vld [vmem:[%s3223_s1 + $0x110] sm:$0xff]  ;;  %v72_v59 = vpack.c.bf16 %v65_v56, %v58_v55  ;;  %v2150_v60 = vld [vmem:[%s3223_s1 + $0x108] sm:$0xff]  ;;  %v2149_v62 = vld [vmem:[%s3223_s1 + $0x100] sm:$0xff] }
  0x21   :  { %522 = vmatpush.bf16.msra.mxu3 %v2141_v37  ;;  %481 = vmatmul.bf16.vlgmr.msra.gmra.mxu0 %v66_v40  ;;  %v2159_v58 = vld [vmem:[%s3223_s1 + $0x150] sm:$0xff]  ;;  %v2158_v61 = vld [vmem:[%s3223_s1 + $0x148] sm:$0xff]  ;;  %v2157_v63 = vld [vmem:[%s3223_s1 + $0x140] sm:$0xff] }
  0x22   :  { %529 = vmatpush.bf16.msrb.mxu0 %v2156_v34  ;;  %495 = vmatmul.bf16.vlgmr.msra.gmra.mxu1 %v67_v43  ;;  %v56_v0 = vld [vmem:[%s3222_s0 + $0x20] sm:$0xff]  ;;  %v63_v1 = vld [vmem:[%s3222_s0 + $0x58] sm:$0xff]  ;;  %v57_v2 = vld [vmem:[%s3222_s0 + $0x28] sm:$0xff] }
  0x23   :  { %543 = vmatpush.bf16.msrb.mxu1 %v2164_v35  ;;  %509 = vmatmul.bf16.vlgmr.msra.gmra.mxu2 %v68_v47  ;;  %v64_v3 = vld [vmem:[%s3222_s0 + $0x60] sm:$0xff]  ;;  %v70_v4 = vpack.c.bf16 %v63_v1, %v56_v0  ;;  %v2173_v6 = vld [vmem:[%s3225_s3 + $0x38] sm:$0xff]  ;;  %v2172_v7 = vld [vmem:[%s3225_s3 + $0x30] sm:$0xff] }
  0x24   :  { %564 = vmatpush.bf16.msrb.mxu2 %v2165_v44  ;;  %523 = vmatmul.bf16.vlgmr.msra.gmra.mxu3 %v69_v48  ;;  %v71_v5 = vpack.c.bf16 %v64_v3, %v57_v2  ;;  %v2171_v8 = vld [vmem:[%s3225_s3 + $0x28] sm:$0xff]  ;;  %v2170_v9 = vld [vmem:[%s3225_s3 + $0x20] sm:$0xff]  ;;  %v2169_v10 = vld [vmem:[%s3225_s3 + $0x18] sm:$0xff] }
  0x25   :  { %642 = vmatpush.bf16.msrb.mxu3 %v2173_v6  ;;  %v2168_v11 = vld [vmem:[%s3225_s3 + $0x10] sm:$0xff]  ;;  %v2167_v12 = vld [vmem:[%s3225_s3 + $0x8] sm:$0xff]  ;;  %v2166_v16 = vld [vmem:[%s3225_s3] sm:$0xff] }
  0x26   :  { %530 = vmatpush.bf16.msrb.mxu0 %v2155_v45  ;;  %v2243_v17 = vld [vmem:[%s3224_s2] ss:$0 sm:$0xff]  ;;  %v2177_v18 = vld [vmem:[%s3227_s5 + $0x18] sm:$0xff]  ;;  %v2176_v47 = vld [vmem:[%s3227_s5 + $0x10] sm:$0xff] }
  0x27   :  { %544 = vmatpush.bf16.msrb.mxu1 %v2163_v46  ;;  %v2175_v48 = vld [vmem:[%s3227_s5 + $0x8] sm:$0xff]  ;;  %v2244_v55 = vld [vmem:[%s3226_s4] ss:$0 sm:$0xff] }
  0x28   :  { %703 = vmatpush.bf16.msra.mxu2 %v2177_v18  ;;  %v2245_v3 = vld [vmem:[%s3228_s6] ss:$0 sm:$0xff] }
  0x29   :  { %643 = vmatpush.bf16.msrb.mxu3 %v2172_v7 }
  0x2a   :  { %531 = vmatpush.bf16.msrb.mxu0 %v2154_v49  ;;  %v2174_v49 = vld [vmem:[%s3227_s5] sm:$0xff] }
  0x2b   :  { %545 = vmatpush.bf16.msrb.mxu1 %v2162_v50  ;;  %v1854_v50 = vld [vmem:[%s3229_s7] sm:$0xf] }
  0x2c   :  { %704 = vmatpush.bf16.msra.mxu2 %v2176_v47  ;;  %v1993_v47 = vld [vmem:[%s3235_s13 + $0xe0] sm:$0xf] }
  0x2d   :  { %644 = vmatpush.bf16.msrb.mxu3 %v2171_v8 }
  0x2e   :  { %532 = vmatpush.bf16.msrb.mxu0 %v2153_v51  ;;  %v2178_v51 = vld [vmem:[%s3229_s7] sm:$0x30] }
  0x2f   :  { %546 = vmatpush.bf16.msrb.mxu1 %v2161_v52  ;;  %v1855_v52 = vor.u32 %v2178_v51, %v1854_v50  ;;  %v2212_v51 = vld [vmem:[%s3235_s13 + $0xe4] sm:$0xf] }
  0x30   :  { %705 = vmatpush.bf16.msra.mxu2 %v2175_v48  ;;  %v2215_v48 = vld [vmem:[%s3235_s13 + $0xf8] sm:$0xf0] }
  0x31   :  { %645 = vmatpush.bf16.msrb.mxu3 %v2170_v9 }
  0x32   :  { %533 = vmatpush.bf16.msrb.mxu0 %v2152_v53  ;;  %v733_v53 = vsel %vm731_vm1, %v1855_v52, 0  ;;  %v2234_v52 = vld [vmem:[%s3235_s13 + $0x194] sm:$0xf] }
  0x33   :  { %547 = vmatpush.bf16.msrb.mxu1 %v2160_v54  ;;  %1802 = vmatmul.msk.bf16.vlgmr.msrb.gmra.mxu2 %vm469_vm0, %v72_v59 }
  0x34   :  { %706 = vmatpush.bf16.msra.mxu2 %v2174_v49 }
  0x35   :  { %646 = vmatpush.bf16.msrb.mxu3 %v2169_v10  ;;  %v2183_v10 = vld [vmem:[%s3233_s11 + $0x18] sm:$0xff] }
  0x36   :  { %534 = vmatpush.bf16.msrb.mxu0 %v2151_v57 }
  0x37   :  { %548 = vmatpush.bf16.msrb.mxu1 %v2159_v58 }
  0x38   :  { %742 = vmatpush.bf16.msrb.mxu2 %v733_v53  ;;  %v2087_v53 = vld [vmem:[%s3235_s13 + $0x1ac] sm:$0xf0] }
  0x39   :  { %647 = vmatpush.bf16.msrb.mxu3 %v2168_v11 }
  0x3a   :  { %535 = vmatpush.bf16.msrb.mxu0 %v2150_v60 }
  0x3b   :  { %549 = vmatpush.bf16.msrb.mxu1 %v2158_v61 }
  0x3d   :  { %648 = vmatpush.bf16.msrb.mxu3 %v2167_v12  ;;  %v2246_v12 = vld [vmem:[%s3230_s8] ss:$0 sm:$0xff] }
  0x3e   :  { %536 = vmatpush.bf16.msrb.mxu0 %v2149_v62  ;;  %v1859_v62 = vld [vmem:[%s3231_s9] sm:$0xf] }
  0x3f   :  { %550 = vmatpush.bf16.msrb.mxu1 %v2157_v63  ;;  %v2179_v63 = vld [vmem:[%s3231_s9] sm:$0x30]  ;;  %s2332_s9 = smov 896  }
  0x40   :  { %v1860_v0 = vor.u32 %v2179_v63, %v1859_v62  ;;  %v2059_v62 = vld [vmem:[%s3235_s13 + $0x174] sm:$0xf0] }
  0x41   :  { %537 = vmatmul.bf16.vlgmr.msrb.gmra.mxu0 %v70_v4  ;;  %649 = vmatpush.bf16.msrb.mxu3 %v2166_v16 }
  0x42   :  { %551 = vmatmul.bf16.vlgmr.msrb.gmra.mxu1 %v71_v5  ;;  %v767_v1 = vsel %vm731_vm1, %v1860_v0, 0 }
  0x43   :  { %776 = vmatpush.bf16.msra.mxu1 %v767_v1  ;;  %v2205_v1 = vld [vmem:[%s3235_s13 + $0xac] sm:$0xf] }
  0x9e   :  { %v482_v13 = vpop.f32.mrf.mxu0 }
  0x9f   :  { %v496_v14 = vpop.f32.mrf.mxu1  ;;  %v483_v19 = vadd.f32 %v2243_v17, %v482_v13 }
  0xa1   :  { %v497_v23 = vadd.f32 %v496_v14, %v483_v19  ;;  %v2182_v19 = vld [vmem:[%s3233_s11 + $0x10] sm:$0xff] }
  0xa6   :  { %v510_v15 = vpop.f32.mrf.mxu2  ;;  %v484_v20 = vpop.f32.mrf.mxu0 }
  0xa7   :  { %v498_v21 = vpop.f32.mrf.mxu1  ;;  %v524_v24 = vpop.f32.mrf.mxu3  ;;  %v485_v25 = vadd.f32 %v2243_v17, %v484_v20  ;;  %v511_v26 = vadd.f32 %v510_v15, %v497_v23  ;;  %v2181_v20 = vld [vmem:[%s3233_s11 + $0x8] sm:$0xff]  ;;  %v2236_v23 = vld [vmem:[%s3235_s13 + $0x1a0] sm:$0xf0] }
  0xa9   :  { %v499_v27 = vadd.f32 %v498_v21, %v485_v25  ;;  %v525_v30 = vadd.f32 %v524_v24, %v511_v26  ;;  %v2180_v21 = vld [vmem:[%s3233_s11] sm:$0xff]  ;;  %v2233_v24 = vld [vmem:[%s3235_s13 + $0x18c] sm:$0xf]  ;;  %v2079_v26 = vld [vmem:[%s3235_s13 + $0x1a4] sm:$0xf0] }
  0xae   :  { %v512_v22 = vpop.f32.mrf.mxu2 }
  0xaf   :  { %v513_v32 = vadd.f32 %v512_v22, %v499_v27  ;;  %v526_v34 = vpop.f32.mrf.mxu3  ;;  %v2077_v22 = vld [vmem:[%s3235_s13 + $0x188] sm:$0xf]  ;;  %v2085_v27 = vld [vmem:[%s3235_s13 + $0x190] sm:$0xf] }
  0xb0   :  { %v2078_v25 = vor.u32 %v2236_v23, %v2077_v22 }
  0xb1   :  { %v527_v35 = vadd.f32 %v526_v34, %v513_v32  ;;  %v2229_v32 = vld [vmem:[%s3235_s13 + $0x168] sm:$0xf0] }
  0xb2   :  { %1210 = vmatpush.bf16.msra.mxu3 %v2078_v25 }
  0xb6   :  { %v566_v31 = vpop.f32.mrf.mxu2 }
  0xbe   :  { %v538_v28 = vpop.f32.mrf.mxu0  ;;  %v568_v42 = vpop.f32.mrf.mxu2 }
  0xbf   :  { %v552_v29 = vpop.f32.mrf.mxu1  ;;  %v539_v33 = vadd.f32 %v538_v28, %v525_v30  ;;  %v2237_v28 = vld [vmem:[%s3235_s13 + $0x1a8] sm:$0xf0] }
  0xc0   :  { %v2086_v30 = vor.u32 %v2237_v28, %v2085_v27  ;;  %v2194_v27 = vld [vmem:[%s3235_s13 + $0x50] sm:$0xf0]  ;;  %v2191_v28 = vld [vmem:[%s3235_s13 + $0x3c] sm:$0xf] }
  0xc1   :  { %v553_v36 = vadd.f32 %v552_v29, %v539_v33  ;;  %v2082_v29 = vor.u32 %v2233_v24, %v2079_v26  ;;  %v2226_v33 = vld [vmem:[%s3235_s13 + $0x154] sm:$0xf]  ;;  %v1909_v26 = vld [vmem:[%s3235_s13 + $0x38] sm:$0xf] }
  0xc2   :  { %1238 = vmatpush.bf16.msrb.mxu1 %v2086_v30  ;;  %v1917_v30 = vld [vmem:[%s3235_s13 + $0x40] sm:$0xf] }
  0xc3   :  { %v567_v40 = vadd.f32 %v566_v31, %v553_v36  ;;  %v2049_v31 = vld [vmem:[%s3235_s13 + $0x150] sm:$0xf]  ;;  %v2057_v36 = vld [vmem:[%s3235_s13 + $0x158] sm:$0xf]  ;;  %1224 = vmatpush.bf16.msra.mxu0 %v2082_v29 }
  0xc4   :  { %v2050_v34 = vor.u32 %v2229_v32, %v2049_v31  ;;  %v1911_v29 = vld [vmem:[%s3235_s13 + $0x54] sm:$0xf0]  ;;  %v2195_v31 = vld [vmem:[%s3235_s13 + $0x58] sm:$0xf0]  ;;  %v1910_v32 = vor.u32 %v2194_v27, %v1909_v26  ;;  %v2217_v26 = vld [vmem:[%s3235_s13 + $0x108] sm:$0xf0] }
  0xc5   :  { %v571_v44 = vmax.f32 %v567_v40, 0.0  ;;  %v2021_v40 = vld [vmem:[%s3235_s13 + $0x118] sm:$0xf]  ;;  %v2214_v27 = vld [vmem:[%s3235_s13 + $0xf4] sm:$0xf] }
  0xc6   :  { %v540_v37 = vpop.f32.mrf.mxu0  ;;  %1211 = vmatpush.bf16.msra.mxu3 %v2050_v34  ;;  %v1914_v34 = vor.u32 %v2191_v28, %v1911_v29  ;;  %v2011_v28 = vld [vmem:[%s3235_s13 + $0x10c] sm:$0xf0] }
  0xc7   :  { %v541_v38 = vadd.f32 %v540_v37, %v527_v35  ;;  %v554_v39 = vpop.f32.mrf.mxu1  ;;  %v2051_v35 = vld [vmem:[%s3235_s13 + $0x16c] sm:$0xf0]  ;;  %v2230_v37 = vld [vmem:[%s3235_s13 + $0x170] sm:$0xf0] }
  0xc9   :  { %v555_v41 = vadd.f32 %v554_v39, %v541_v38  ;;  %v2054_v38 = vor.u32 %v2226_v33, %v2051_v35  ;;  %v2058_v39 = vor.u32 %v2230_v37, %v2057_v36  ;;  %v1918_v35 = vor.u32 %v2195_v31, %v1917_v30  ;;  %v1881_v36 = vld [vmem:[%s3235_s13] sm:$0xf]  ;;  %v2187_v37 = vld [vmem:[%s3235_s13 + $0x18] sm:$0xf0]  ;;  %v2017_v31 = vld [vmem:[%s3235_s13 + $0xf8] sm:$0xf] }
  0xca   :  { %v2014_v30 = vor.u32 %v2214_v27, %v2011_v28 }
  0xcb   :  { %v569_v43 = vadd.f32 %v568_v42, %v555_v41  ;;  %v2222_v41 = vld [vmem:[%s3235_s13 + $0x130] sm:$0xf0]  ;;  %v2219_v42 = vld [vmem:[%s3235_s13 + $0x11c] sm:$0xf]  ;;  %1225 = vmatpush.bf16.msra.mxu0 %v2054_v38  ;;  %1239 = vmatpush.bf16.msrb.mxu1 %v2058_v39  ;;  %v2184_v39 = vld [vmem:[%s3235_s13 + $0x4] sm:$0xf] }
  0xcd   :  { %v572_v45 = vmax.f32 %v569_v43, 0.0  ;;  %v2023_v43 = vld [vmem:[%s3235_s13 + $0x134] sm:$0xf0] }
  0xce   :  { %v2026_v49 = vor.u32 %v2219_v42, %v2023_v43  ;;  %v1889_v42 = vld [vmem:[%s3235_s13 + $0x8] sm:$0xf]  ;;  %v2188_v43 = vld [vmem:[%s3235_s13 + $0x20] sm:$0xf0] }
  0xcf   :  { %v573_v46 = vpack.c.bf16 %v572_v45, %v571_v44  ;;  %v2029_v44 = vld [vmem:[%s3235_s13 + $0x120] sm:$0xf]  ;;  %v2223_v45 = vld [vmem:[%s3235_s13 + $0x138] sm:$0xf0] }
  0xd0   :  { %v2030_v50 = vor.u32 %v2223_v45, %v2029_v44  ;;  %1226 = vmatpush.bf16.msra.mxu0 %v2026_v49  ;;  %v1882_v44 = vor.u32 %v2187_v37, %v1881_v36  ;;  %v2207_v36 = vld [vmem:[%s3235_s13 + $0xbc] sm:$0xf] }
  0xd1   :  { %650 = vmatmul.bf16.vlgmr.msrb.gmra.mxu3 %v573_v46  ;;  %v2022_v46 = vor.u32 %v2222_v41, %v2021_v40  ;;  %v1883_v40 = vld [vmem:[%s3235_s13 + $0x1c] sm:$0xf0] }
  0xd2   :  { %1240 = vmatpush.bf16.msrb.mxu1 %v2030_v50  ;;  %v2206_v50 = vld [vmem:[%s3235_s13 + $0xb4] sm:$0xf] }
  0xd3   :  { %1212 = vmatpush.bf16.msra.mxu3 %v2022_v46 }
 0x154   :  { %v651_v54 = vpop.f32.mrf.mxu3 }
 0x155   :  { %v652_v56 = vadd.f32 %v2244_v55, %v651_v54  ;;  %v1995_v54 = vld [vmem:[%s3235_s13 + $0xfc] sm:$0xf0] }
 0x156   :  { %v1998_v63 = vor.u32 %v2212_v51, %v1995_v54  ;;  %v1975_v51 = vld [vmem:[%s3235_s13 + $0xcc] sm:$0xf0]  ;;  %v2238_v54 = vld [vmem:[%s3235_s13 + $0x1b0] sm:$0xf0] }
 0x157   :  { %v656_v59 = vmax.f32 %v652_v56, 0.0  ;;  %v2216_v56 = vld [vmem:[%s3235_s13 + $0x100] sm:$0xf0] }
 0x158   :  { %1227 = vmatpush.bf16.msra.mxu0 %v1998_v63  ;;  %v1947_v63 = vld [vmem:[%s3235_s13 + $0x94] sm:$0xf0] }
 0x15c   :  { %v653_v57 = vpop.f32.mrf.mxu3 }
 0x15d   :  { %v654_v58 = vadd.f32 %v2244_v55, %v653_v57  ;;  %v2001_v55 = vld [vmem:[%s3235_s13 + $0xe8] sm:$0xf]  ;;  %v2090_v57 = vor.u32 %v2234_v52, %v2087_v53  ;;  %v2093_v52 = vld [vmem:[%s3235_s13 + $0x198] sm:$0xf]  ;;  %v1978_v53 = vor.u32 %v2206_v50, %v1975_v51 }
 0x15e   :  { %v2002_v0 = vor.u32 %v2216_v56, %v2001_v55  ;;  %v2235_v55 = vld [vmem:[%s3235_s13 + $0x19c] sm:$0xf]  ;;  %v2095_v56 = vld [vmem:[%s3235_s13 + $0x1b4] sm:$0xf0] }
 0x15f   :  { %v657_v60 = vmax.f32 %v654_v58, 0.0  ;;  %v2227_v58 = vld [vmem:[%s3235_s13 + $0x15c] sm:$0xf] }
 0x160   :  { %1241 = vmatpush.bf16.msrb.mxu1 %v2002_v0  ;;  %v2065_v0 = vld [vmem:[%s3235_s13 + $0x160] sm:$0xf] }
 0x161   :  { %v658_v61 = vpack.c.bf16 %v657_v60, %v656_v59  ;;  %v1994_v59 = vor.u32 %v2215_v48, %v1993_v47  ;;  %v1965_v60 = vld [vmem:[%s3235_s13 + $0xa8] sm:$0xf]  ;;  %v1886_v47 = vor.u32 %v2184_v39, %v1883_v40  ;;  %v1890_v48 = vor.u32 %v2188_v43, %v1889_v42  ;;  %v1989_v39 = vld [vmem:[%s3235_s13 + $0xc0] sm:$0xf]  ;;  %v2211_v40 = vld [vmem:[%s3235_s13 + $0xd8] sm:$0xf0] }
 0x162   :  { %v1990_v42 = vor.u32 %v2211_v40, %v1989_v39  ;;  %v1953_v43 = vld [vmem:[%s3235_s13 + $0x80] sm:$0xf] }
 0x163   :  { %1851 = vmatmul.msk.bf16.vlgmr.msra.gmra.mxu2 %vm695_vm2, %v658_v61  ;;  %v2208_v61 = vld [vmem:[%s3235_s13 + $0xc0] sm:$0xf0]  ;;  %1213 = vmatpush.bf16.msra.mxu3 %v1994_v59  ;;  %v2101_v59 = vld [vmem:[%s3235_s13 + $0x1a0] sm:$0xf] }
 0x164   :  { %829 = vmatpush.bf16.msra.mxu2 %v2183_v10  ;;  %v2201_v10 = vld [vmem:[%s3235_s13 + $0x88] sm:$0xf0] }
 0x168   :  { %830 = vmatpush.bf16.msra.mxu2 %v2182_v19  ;;  %v1945_v19 = vld [vmem:[%s3235_s13 + $0x78] sm:$0xf] }
 0x16c   :  { %831 = vmatpush.bf16.msra.mxu2 %v2181_v20  ;;  %v2202_v20 = vld [vmem:[%s3235_s13 + $0x90] sm:$0xf0] }
 0x16d   :  { %v1946_v25 = vor.u32 %v2202_v20, %v1945_v19  ;;  %v2045_v19 = vld [vmem:[%s3235_s13 + $0x130] sm:$0xf]  ;;  %v2225_v20 = vld [vmem:[%s3235_s13 + $0x148] sm:$0xf0] }
 0x170   :  { %832 = vmatpush.bf16.msra.mxu2 %v2180_v21  ;;  %v2247_v21 = vld [vmem:[%s3232_s10] ss:$0 sm:$0xff]  ;;  %s1594_s10 = sshll.u32 %s3237_s15, 4  ;;  %s1595_s10 = int_to_ptr.hbm [resolvable:$true] %s1594_s10 }
 0x1e6   :  { %v708_v2 = vpop.f32.mrf.mxu2 }
 0x1e7   :  { %v709_v4 = vadd.f32 %v2245_v3, %v708_v2  ;;  %v1967_v2 = vld [vmem:[%s3235_s13 + $0xc4] sm:$0xf0] }
 0x1e9   :  { %v713_v7 = vmax.f32 %v709_v4, 0.0  ;;  %v2062_v4 = vor.u32 %v2227_v58, %v2059_v62  ;;  %v2098_v58 = vor.u32 %v2235_v55, %v2095_v56  ;;  %v2199_v62 = vld [vmem:[%s3235_s13 + $0x7c] sm:$0xf]  ;;  %v1927_v55 = vld [vmem:[%s3235_s13 + $0x64] sm:$0xf0] }
 0x1ea   :  { %v1933_v56 = vld [vmem:[%s3235_s13 + $0x50] sm:$0xf] }
 0x1ee   :  { %v710_v5 = vpop.f32.mrf.mxu2 }
 0x1ef   :  { %v711_v6 = vadd.f32 %v2245_v3, %v710_v5  ;;  %v1973_v3 = vld [vmem:[%s3235_s13 + $0xb0] sm:$0xf]  ;;  %v2209_v5 = vld [vmem:[%s3235_s13 + $0xc8] sm:$0xf0] }
 0x1f1   :  { %v714_v8 = vmax.f32 %v711_v6, 0.0  ;;  %v2220_v6 = vld [vmem:[%s3235_s13 + $0x124] sm:$0xf] }
 0x1f3   :  { %v715_v9 = vpack.c.bf16 %v714_v8, %v713_v7  ;;  %v2031_v7 = vld [vmem:[%s3235_s13 + $0x13c] sm:$0xf0]  ;;  %v1966_v8 = vor.u32 %v2208_v61, %v1965_v60  ;;  %v2239_v60 = vld [vmem:[%s3235_s13 + $0x1b8] sm:$0xf0] }
 0x1f4   :  { %v2102_v61 = vor.u32 %v2239_v60, %v2101_v59 }
 0x1f5   :  { %1856 = vmatmul.msk.bf16.vlgmr.msrb.gmra.mxu2 %vm727_vm3, %v715_v9  ;;  %v1937_v9 = vld [vmem:[%s3235_s13 + $0x70] sm:$0xf]  ;;  %1214 = vmatpush.bf16.msra.mxu3 %v1966_v8  ;;  %v2232_v8 = vld [vmem:[%s3235_s13 + $0x180] sm:$0xf0] }
 0x1f6   :  { %1252 = vmatpush.bf16.msrb.mxu2 %v2090_v57  ;;  %v1938_v22 = vor.u32 %v2201_v10, %v1937_v9  ;;  %v2094_v57 = vor.u32 %v2238_v54, %v2093_v52  ;;  %v2192_v10 = vld [vmem:[%s3235_s13 + $0x44] sm:$0xf]  ;;  %v1925_v52 = vld [vmem:[%s3235_s13 + $0x48] sm:$0xf]  ;;  %v2193_v54 = vld [vmem:[%s3235_s13 + $0x4c] sm:$0xf] }
 0x1f7   :  { %v1930_v59 = vor.u32 %v2193_v54, %v1927_v55 }
 0x1f9   :  { %1215 = vmatpush.bf16.msra.mxu3 %v1938_v22  ;;  %v2185_v22 = vld [vmem:[%s3235_s13 + $0xc] sm:$0xf] }
 0x1fa   :  { %1253 = vmatpush.bf16.msrb.mxu2 %v2062_v4  ;;  %v2067_v4 = vld [vmem:[%s3235_s13 + $0x17c] sm:$0xf0] }
 0x1fd   :  { %1216 = vmatpush.bf16.msra.mxu3 %v1910_v32  ;;  %v2218_v32 = vld [vmem:[%s3235_s13 + $0x110] sm:$0xf0] }
 0x201   :  { %1217 = vmatpush.bf16.msra.mxu3 %v1882_v44  ;;  %v2203_v44 = vld [vmem:[%s3235_s13 + $0x98] sm:$0xf0] }
 0x205   :  { %1266 = vmatpush.bf16.msrb.mxu3 %v2094_v57  ;;  %v2197_v57 = vld [vmem:[%s3235_s13 + $0x68] sm:$0xf0] }
 0x206   :  { %v1934_v60 = vor.u32 %v2197_v57, %v1933_v56 }
 0x278   :  { %v744_v11 = vpop.f32.mrf.mxu2 }
 0x279   :  { %v745_v13 = vadd.f32 %v2246_v12, %v744_v11  ;;  %v2034_v11 = vor.u32 %v2220_v6, %v2031_v7  ;;  %v2073_v7 = vld [vmem:[%s3235_s13 + $0x168] sm:$0xf] }
 0x27a   :  { %v2074_v9 = vor.u32 %v2232_v8, %v2073_v7  ;;  %v2248_v7 = vld [vmem:[%s3234_s12] ss:$0 sm:$0xff]  ;;  %s2331_s12 = smov [#allocation2]  }
 0x27b   :  { %v749_v16 = vmax.f32 %v745_v13, 0.0  ;;  %v1974_v13 = vor.u32 %v2209_v5, %v1973_v3  ;;  %1254 = vmatpush.bf16.msrb.mxu2 %v2034_v11  ;;  %v2228_v3 = vld [vmem:[%s3235_s13 + $0x164] sm:$0xf]  ;;  %v1919_v11 = vld [vmem:[%s3235_s13 + $0x5c] sm:$0xf0] }
 0x27c   :  { %v2070_v6 = vor.u32 %v2228_v3, %v2067_v4 }
 0x27d   :  { %1242 = vmatpush.bf16.msrb.mxu1 %v1974_v13  ;;  %v1922_v13 = vor.u32 %v2192_v10, %v1919_v11 }
 0x280   :  { %v746_v14 = vpop.f32.mrf.mxu2 }
 0x281   :  { %v747_v15 = vadd.f32 %v2246_v12, %v746_v14  ;;  %v1970_v12 = vor.u32 %v2205_v1, %v1967_v2  ;;  %v2198_v14 = vld [vmem:[%s3235_s13 + $0x74] sm:$0xf]  ;;  %1243 = vmatpush.bf16.msrb.mxu1 %v1946_v25  ;;  %v1950_v1 = vor.u32 %v2199_v62, %v1947_v63  ;;  %v2231_v2 = vld [vmem:[%s3235_s13 + $0x178] sm:$0xf0]  ;;  %v2189_v62 = vld [vmem:[%s3235_s13 + $0x28] sm:$0xf0] }
 0x282   :  { %v2066_v5 = vor.u32 %v2231_v2, %v2065_v0  ;;  %v2186_v63 = vld [vmem:[%s3235_s13 + $0x14] sm:$0xf]  ;;  %v1899_v0 = vld [vmem:[%s3235_s13 + $0x2c] sm:$0xf0] }
 0x283   :  { %v750_v17 = vmax.f32 %v747_v15, 0.0  ;;  %v2213_v15 = vld [vmem:[%s3235_s13 + $0xec] sm:$0xf]  ;;  %1228 = vmatpush.bf16.msra.mxu0 %v1970_v12  ;;  %v2037_v12 = vld [vmem:[%s3235_s13 + $0x128] sm:$0xf]  ;;  %v1902_v4 = vor.u32 %v2186_v63, %v1899_v0 }
 0x284   :  { %1267 = vmatpush.bf16.msrb.mxu3 %v2066_v5  ;;  %v2190_v2 = vld [vmem:[%s3235_s13 + $0x30] sm:$0xf0] }
 0x285   :  { %v751_v18 = vpack.c.bf16 %v750_v17, %v749_v16  ;;  %v2003_v16 = vld [vmem:[%s3235_s13 + $0x104] sm:$0xf0]  ;;  %1244 = vmatpush.bf16.msrb.mxu1 %v1918_v35  ;;  %v2210_v35 = vld [vmem:[%s3235_s13 + $0xd0] sm:$0xf0] }
 0x286   :  { %v2006_v23 = vor.u32 %v2213_v15, %v2003_v16  ;;  %v2221_v15 = vld [vmem:[%s3235_s13 + $0x12c] sm:$0xf]  ;;  %v2039_v16 = vld [vmem:[%s3235_s13 + $0x144] sm:$0xf0] }
 0x287   :  { %1861 = vmatmul.msk.bf16.vlgmr.msra.gmra.mxu1 %vm727_vm3, %v751_v18  ;;  %v1939_v18 = vld [vmem:[%s3235_s13 + $0x8c] sm:$0xf0] }
 0x288   :  { %v1942_v24 = vor.u32 %v2198_v14, %v1939_v18  ;;  %1255 = vmatpush.bf16.msrb.mxu2 %v2006_v23  ;;  %v2224_v14 = vld [vmem:[%s3235_s13 + $0x140] sm:$0xf0]  ;;  %v2042_v18 = vor.u32 %v2221_v15, %v2039_v16  ;;  %v1891_v23 = vld [vmem:[%s3235_s13 + $0x24] sm:$0xf0] }
 0x289   :  { %1245 = vmatpush.bf16.msrb.mxu1 %v1890_v48  ;;  %v1894_v25 = vor.u32 %v2185_v22, %v1891_v23  ;;  %v1961_v48 = vld [vmem:[%s3235_s13 + $0x88] sm:$0xf] }
 0x28a   :  { %1229 = vmatpush.bf16.msra.mxu0 %v1942_v24  ;;  %v2009_v24 = vld [vmem:[%s3235_s13 + $0xf0] sm:$0xf] }
 0x28b   :  { %v2010_v29 = vor.u32 %v2217_v26, %v2009_v24 }
 0x28c   :  { %1256 = vmatpush.bf16.msrb.mxu2 %v1978_v53  ;;  %v2196_v53 = vld [vmem:[%s3235_s13 + $0x60] sm:$0xf0] }
 0x28d   :  { %1294 = vmatpush.bf16.msra.mxu1 %v2102_v61  ;;  %v1897_v61 = vld [vmem:[%s3235_s13 + $0x10] sm:$0xf] }
 0x28e   :  { %1230 = vmatpush.bf16.msra.mxu0 %v1914_v34  ;;  %v1981_v34 = vld [vmem:[%s3235_s13 + $0xb8] sm:$0xf]  ;;  %v1898_v3 = vor.u32 %v2189_v62, %v1897_v61 }
 0x28f   :  { %v1982_v37 = vor.u32 %v2210_v35, %v1981_v34 }
 0x290   :  { %1257 = vmatpush.bf16.msrb.mxu2 %v1950_v1  ;;  %v1905_v1 = vld [vmem:[%s3235_s13 + $0x18] sm:$0xf] }
 0x291   :  { %1295 = vmatpush.bf16.msra.mxu1 %v2074_v9  ;;  %v1906_v5 = vor.u32 %v2190_v2, %v1905_v1 }
 0x292   :  { %1231 = vmatpush.bf16.msra.mxu0 %v1886_v47  ;;  %v1955_v47 = vld [vmem:[%s3235_s13 + $0x9c] sm:$0xf0] }
 0x294   :  { %1258 = vmatpush.bf16.msrb.mxu2 %v1922_v13 }
 0x296   :  { %1280 = vmatpush.bf16.msrb.mxu0 %v2098_v58  ;;  %v1926_v58 = vor.u32 %v2196_v53, %v1925_v52 }
 0x298   :  { %1259 = vmatpush.bf16.msrb.mxu2 %v1894_v25 }
 0x29a   :  { %1281 = vmatpush.bf16.msrb.mxu0 %v2070_v6 }
 0x29e   :  { %1282 = vmatpush.bf16.msrb.mxu0 %v2042_v18 }
 0x2a2   :  { %1283 = vmatpush.bf16.msrb.mxu0 %v2014_v30 }
 0x304   :  { %v778_v17 = vpop.f32.mrf.mxu1 }
 0x305   :  { %v779_v33 = vadd.f32 %v2247_v21, %v778_v17  ;;  %v2038_v17 = vor.u32 %v2224_v14, %v2037_v12  ;;  %v3025_v14 = vld [vmem:[%s3236_s14] sm:$0x7f]  ;;  %s1592_s14 = sshll.u32 %s2331_s12, 4  ;;  %s1593_s14 = int_to_ptr.vmem [resolvable:$true] %s1592_s14 }
 0x306   :  { %v909_v15 = vperm.slane %v3025_v14, 1  ;;  %v910_v16 = vperm.slane %v3025_v14, 2  ;;  %v908_v22 = vperm.slane %v3025_v14, 0  ;;  %v911_v24 = vperm.slane %v3025_v14, 3 }
 0x307   :  { %v783_v45 = vmax.f32 %v779_v33, 0.0  ;;  %1268 = vmatpush.bf16.msrb.mxu3 %v2038_v17  ;;  %v2018_v33 = vor.u32 %v2218_v32, %v2017_v31 }
 0x30b   :  { %1269 = vmatpush.bf16.msrb.mxu3 %v2010_v29 }
 0x30c   :  { %v780_v38 = vpop.f32.mrf.mxu1 }
 0x30d   :  { %v781_v41 = vadd.f32 %v2247_v21, %v780_v38  ;;  %v2046_v21 = vor.u32 %v2225_v20, %v2045_v19  ;;  %v1983_v38 = vld [vmem:[%s3235_s13 + $0xd4] sm:$0xf0] }
 0x30f   :  { %v784_v46 = vmax.f32 %v781_v41, 0.0  ;;  %1296 = vmatpush.bf16.msra.mxu1 %v2046_v21  ;;  %v1986_v41 = vor.u32 %v2207_v36, %v1983_v38  ;;  %1270 = vmatpush.bf16.msrb.mxu3 %v1982_v37 }
 0x311   :  { %v785_v49 = vpack.c.bf16 %v784_v46, %v783_v45  ;;  %v2200_v45 = vld [vmem:[%s3235_s13 + $0x84] sm:$0xf]  ;;  %v1954_v46 = vor.u32 %v2203_v44, %v1953_v43  ;;  %1284 = vmatpush.bf16.msrb.mxu0 %v1986_v41  ;;  %v913_v43 = vperm.slane %v3025_v14, 5 }
 0x312   :  { %v1958_v50 = vor.u32 %v2200_v45, %v1955_v47 }
 0x313   :  { %1878 = vmatmul.msk.bf16.vlgmr.msra.gmra.mxu2 %vm695_vm2, %v785_v49  ;;  %1297 = vmatpush.bf16.msra.mxu1 %v2018_v33  ;;  %v2204_v49 = vld [vmem:[%s3235_s13 + $0xa0] sm:$0xf0] }
 0x314   :  { %v1962_v51 = vor.u32 %v2204_v49, %v1961_v48  ;;  %1271 = vmatpush.bf16.msrb.mxu3 %v1954_v46  ;;  %v914_v49 = vperm.slane %v3025_v14, 6 }
 0x315   :  { %1285 = vmatpush.bf16.msrb.mxu0 %v1958_v50 }
 0x317   :  { %1298 = vmatpush.bf16.msra.mxu1 %v1990_v42 }
 0x318   :  { %1272 = vmatpush.bf16.msrb.mxu3 %v1926_v58 }
 0x319   :  { %1286 = vmatpush.bf16.msrb.mxu0 %v1930_v59  ;;  %v912_v59 = vperm.slane %v3025_v14, 4 }
 0x31b   :  { %1299 = vmatpush.bf16.msra.mxu1 %v1962_v51 }
 0x31c   :  { %1273 = vmatpush.bf16.msrb.mxu3 %v1898_v3 }
 0x31d   :  { %1287 = vmatpush.bf16.msrb.mxu0 %v1902_v4 }
 0x31f   :  { %1300 = vmatpush.bf16.msra.mxu1 %v1934_v60 }
 0x323   :  { %1301 = vmatpush.bf16.msra.mxu1 %v1906_v5 }
 0x396   :  { %v834_v6 = vpop.f32.mrf.mxu2 }
 0x397   :  { %v835_v8 = vadd.f32 %v2248_v7, %v834_v6 }
 0x399   :  { %v839_v11 = vmax.f32 %v835_v8, 0.0 }
 0x39e   :  { %v836_v9 = vpop.f32.mrf.mxu2 }
 0x39f   :  { %v837_v10 = vadd.f32 %v2248_v7, %v836_v9 }
 0x3a1   :  { %v840_v12 = vmax.f32 %v837_v10, 0.0 }
 0x3a3   :  { %v841_v13 = vpack.c.bf16 %v840_v12, %v839_v11 }
 0x3a5   :  { %1218 = vmatmul.bf16.vlgmr.msra.gmra.mxu3 %v841_v13  ;;  %1232 = vmatmul.bf16.vlgmr.msra.gmra.mxu0 %v841_v13 }
 0x3a6   :  { %1246 = vmatmul.bf16.vlgmr.msrb.gmra.mxu1 %v841_v13  ;;  %1260 = vmatmul.bf16.vlgmr.msrb.gmra.mxu2 %v841_v13 }
 0x3b5   :  { %1274 = vmatmul.bf16.vlgmr.msrb.gmra.mxu3 %v841_v13  ;;  %1288 = vmatmul.bf16.vlgmr.msrb.gmra.mxu0 %v841_v13 }
 0x3b6   :  { %1302 = vmatmul.bf16.vlgmr.msra.gmra.mxu1 %v841_v13 }
 0x422   :  { %v1233_v17 = vpop.f32.mrf.mxu0 }
 0x423   :  { %v1234_v18 = vadd.f32 %v1233_v17, %v909_v15  ;;  %v1247_v19 = vpop.f32.mrf.mxu1 }
 0x424   :  { %v1248_v20 = vadd.f32 %v1247_v19, %v910_v16 }
 0x425   :  { %v2104_v21 = vmul.f32 -1.442695, %v1234_v18 }
 0x426   :  { %v2105_v23 = vmul.f32 -1.442695, %v1248_v20 }
 0x427   :  { %2249 = vpow2.f32 %v2104_v21 }
 0x428   :  { %2251 = vpow2.f32 %v2105_v23  ;;  %v1219_v25 = vpop.f32.mrf.mxu3 }
 0x429   :  { %v1220_v26 = vadd.f32 %v1219_v25, %v908_v22  ;;  %v1261_v27 = vpop.f32.mrf.mxu2 }
 0x42a   :  { %v1262_v28 = vadd.f32 %v1261_v27, %v911_v24  ;;  %v1235_v29 = vpop.f32.mrf.mxu0 }
 0x42b   :  { %v2103_v30 = vmul.f32 -1.442695, %v1220_v26  ;;  %v1236_v31 = vadd.f32 %v1235_v29, %v909_v15  ;;  %v1249_v32 = vpop.f32.mrf.mxu1 }
 0x42c   :  { %v2106_v33 = vmul.f32 -1.442695, %v1262_v28  ;;  %v1250_v34 = vadd.f32 %v1249_v32, %v910_v16 }
 0x42d   :  { %v2250_v35 = vpop.eup %2249  ;;  %2253 = vpow2.f32 %v2103_v30  ;;  %v2111_v36 = vmul.f32 -1.442695, %v1236_v31 }
 0x42e   :  { %v2252_v37 = vpop.eup %2251  ;;  %v3031_v38 = vadd.f32 1.0, %v2250_v35  ;;  %2255 = vpow2.f32 %v2106_v33  ;;  %v2112_v39 = vmul.f32 -1.442695, %v1250_v34 }
 0x42f   :  { %v3033_v40 = vadd.f32 1.0, %v2252_v37  ;;  %2257 = vpow2.f32 %v2111_v36 }
 0x430   :  { %2259 = vrcp.f32 %v3031_v38  ;;  %v1221_v41 = vpop.f32.mrf.mxu3  ;;  %v1388_v47 = vand.u32 2147483647, %v3031_v38  ;;  %v1390_v48 = vand.u32 2147483648, %v3031_v38  ;;  %vm1384_vm4 = vweird.f32 %v3031_v38 }
 0x431   :  { %2261 = vrcp.f32 %v3033_v40  ;;  %v1263_v42 = vpop.f32.mrf.mxu2  ;;  %v1222_v44 = vadd.f32 %v1221_v41, %v908_v22  ;;  %v1403_v51 = vand.u32 2147483647, %v3033_v40  ;;  %v1405_v52 = vand.u32 2147483648, %v3033_v40 }
 0x432   :  { %2263 = vpow2.f32 %v2112_v39  ;;  %v1289_v45 = vpop.f32.mrf.mxu0  ;;  %v1264_v54 = vadd.f32 %v1263_v42, %v911_v24  ;;  %vm1399_vm5 = vweird.f32 %v3033_v40  ;;  %vm3054_vm6 = vcmp.eq.f32.partialorder %v1388_v47, 8.507059e+37 }
 0x433   :  { %v2254_v46 = vpop.eup %2253  ;;  %v1290_v57 = vadd.f32 %v1289_v45, %v913_v43  ;;  %v1303_v58 = vpop.f32.mrf.mxu1  ;;  %v2110_v61 = vmul.f32 -1.442695, %v1222_v44  ;;  %v1391_v1 = vor.u32 1.1754944e-38, %v1390_v48  ;;  %vm3060_vm7 = vcmp.eq.f32.partialorder %v1403_v51, 8.507059e+37 }
 0x434   :  { %v2256_v50 = vpop.eup %2255  ;;  %v3043_v53 = vadd.f32 1.0, %v2254_v46  ;;  %v1406_v5 = vor.u32 1.1754944e-38, %v1405_v52  ;;  %v3064_v6 = vmul.f32 -1.442695, %v1264_v54  ;;  %v1304_v7 = vadd.f32 %v1303_v58, %v914_v49 }
 0x435   :  { %v2258_v55 = vpop.eup %2257  ;;  %v3045_v56 = vadd.f32 1.0, %v2256_v50  ;;  %v3071_v11 = vmul.f32 -1.442695, %v1290_v57 }
 0x436   :  { %v2260_v60 = vpop.eup %2259  ;;  %2265 = vrcp.f32 %v3043_v53  ;;  %v1373_v9 = vand.u32 2147483647, %v3043_v53  ;;  %v3069_v10 = vadd.f32 1.0, %v2258_v55  ;;  %v1375_v13 = vand.u32 2147483648, %v3043_v53 }
 0x437   :  { %v2262_v62 = vpop.eup %2261  ;;  %v1380_v63 = vmul.f32 %v2260_v60, %v3031_v38  ;;  %2267 = vrcp.f32 %v3045_v56  ;;  %vm1385_vm8 = vweird.f32 %v2260_v60  ;;  %v1418_v17 = vand.u32 2147483647, %v3045_v56 }
 0x438   :  { %v2264_v2 = vpop.eup %2263  ;;  %v1395_v3 = vmul.f32 %v2262_v62, %v3033_v40  ;;  %2269 = vpow2.f32 %v2110_v61  ;;  %vm1400_vm9 = vweird.f32 %v2262_v62  ;;  %vm1369_vm10 = vweird.f32 %v3043_v53  ;;  %vm1386_vm13 = vmor %vm1384_vm4, %vm1385_vm8  ;;  %v1275_v37 = vpop.f32.mrf.mxu3 }
 0x439   :  { %v1381_v8 = vsub.f32 1.0, %v1380_v63  ;;  %v3074_v15 = vadd.f32 1.0, %v2264_v2  ;;  %2271 = vrcp.f32 %v3069_v10  ;;  %vm1414_vm11 = vweird.f32 %v3045_v56  ;;  %vm1401_vm14 = vmor %vm1399_vm5, %vm1400_vm9 }
 0x43a   :  { %v1396_v12 = vsub.f32 1.0, %v1395_v3  ;;  %vm3081_vm12 = vcmp.eq.f32.partialorder %v1373_v9, 8.507059e+37  ;;  %v1376_v25 = vor.u32 1.1754944e-38, %v1375_v13  ;;  %v1420_v27 = vand.u32 2147483648, %v3045_v56 }
 0x43b   :  { %v1382_v16 = vmul.f32 %v2260_v60, %v1381_v8  ;;  %2273 = vrcp.f32 %v3074_v15  ;;  %vm3092_vm15 = vcmp.eq.f32.partialorder %v1418_v17, 8.507059e+37  ;;  %v2109_v31 = vmul.f32 -1.442695, %v1304_v7  ;;  %v1305_v63 = vpop.f32.mrf.mxu1 }
 0x43c   :  { %v2266_v18 = vpop.eup %2265  ;;  %v1397_v19 = vmul.f32 %v2262_v62, %v1396_v12  ;;  %v1493_v36 = vand.u32 2147483647, %v3069_v10  ;;  %v1421_v44 = vor.u32 1.1754944e-38, %v1420_v27  ;;  %vm1489_vm3 = vweird.f32 %v3069_v10 }
 0x43d   :  { %v2268_v20 = vpop.eup %2267  ;;  %v1383_v21 = vadd.f32 %v2260_v60, %v1382_v16  ;;  %v1365_v22 = vmul.f32 %v2266_v18, %v3043_v53  ;;  %vm1370_vm1 = vweird.f32 %v2266_v18  ;;  %v1495_v48 = vand.u32 2147483648, %v3069_v10 }
 0x43e   :  { %v1398_v24 = vadd.f32 %v2262_v62, %v1397_v19  ;;  %v1410_v26 = vmul.f32 %v2268_v20, %v3045_v56  ;;  %v2270_v32 = vpop.eup %2269  ;;  %vm1415_vm2 = vweird.f32 %v2268_v20  ;;  %vm1371_vm4 = vmor %vm1369_vm10, %vm1370_vm1  ;;  %vm3109_vm5 = vcmp.eq.f32.partialorder %v1493_v36, 8.507059e+37 }
 0x43f   :  { %v1387_v28 = vsel %vm1386_vm13, %v2260_v60, %v1383_v21  ;;  %v1366_v29 = vsub.f32 1.0, %v1365_v22  ;;  %v2272_v38 = vpop.eup %2271  ;;  %v3101_v41 = vadd.f32 1.0, %v2270_v32  ;;  %v1508_v57 = vand.u32 2147483647, %v3074_v15 }
 0x440   :  { %v1392_v33 = vsel %vm3054_vm6, %v1391_v1, %v1387_v28  ;;  %v1402_v34 = vsel %vm1401_vm14, %v2262_v62, %v1398_v24  ;;  %v1411_v35 = vsub.f32 1.0, %v1410_v26  ;;  %v1485_v45 = vmul.f32 %v2272_v38, %v3069_v10  ;;  %vm1416_vm6 = vmor %vm1414_vm11, %vm1415_vm2  ;;  %v1291_v62 = vpop.f32.mrf.mxu0  ;;  %v1277_v12 = vpop.f32.mrf.mxu3 }
 0x441   :  { %1575 = vst [vmem:[#allocation2 + $0x8] sm:$0xff] %v1392_v33  ;;  %v1407_v39 = vsel %vm3060_vm7, %v1406_v5, %v1402_v34  ;;  %v1367_v40 = vmul.f32 %v2266_v18, %v1366_v29  ;;  %v2274_v46 = vpop.eup %2273  ;;  %2275 = vrcp.f32 %v3101_v41  ;;  %vm1490_vm7 = vweird.f32 %v2272_v38 }
 0x442   :  { %1576 = vst [vmem:[#allocation2 + $0x10] sm:$0xff] %v1407_v39  ;;  %v1412_v42 = vmul.f32 %v2268_v20, %v1411_v35  ;;  %v1486_v51 = vsub.f32 1.0, %v1485_v45  ;;  %v1500_v54 = vmul.f32 %v2274_v46, %v3074_v15  ;;  %2277 = vpow2.f32 %v3064_v6  ;;  %vm1491_vm9 = vmor %vm1489_vm3, %vm1490_vm7 }
 0x443   :  { %v1368_v47 = vadd.f32 %v2266_v18, %v1367_v40  ;;  %vm1505_vm8 = vweird.f32 %v2274_v46  ;;  %v1510_v56 = vand.u32 2147483648, %v3074_v15  ;;  %2279 = vpow2.f32 %v3071_v11 }
 0x444   :  { %v1413_v50 = vadd.f32 %v2268_v20, %v1412_v42  ;;  %v1487_v60 = vmul.f32 %v2272_v38, %v1486_v51  ;;  %v1501_v61 = vsub.f32 1.0, %v1500_v54  ;;  %2281 = vpow2.f32 %v2109_v31 }
 0x445   :  { %v1372_v55 = vsel %vm1371_vm4, %v2266_v18, %v1368_v47  ;;  %v1276_v3 = vadd.f32 %v1275_v37, %v912_v59  ;;  %v1496_v5 = vor.u32 1.1754944e-38, %v1495_v48  ;;  %vm1504_vm10 = vweird.f32 %v3074_v15 }
 0x446   :  { %v1377_v53 = vsel %vm3081_vm12, %v1376_v25, %v1372_v55  ;;  %v1417_v58 = vsel %vm1416_vm6, %v2268_v20, %v1413_v50  ;;  %v1488_v1 = vadd.f32 %v2272_v38, %v1487_v60  ;;  %v1502_v2 = vmul.f32 %v2274_v46, %v1501_v61  ;;  %vm1506_vm12 = vmor %vm1504_vm10, %vm1505_vm8 }
 0x447   :  { %1574 = vst [vmem:[#allocation2] sm:$0xff] %v1377_v53  ;;  %v1422_v0 = vsel %vm3092_vm15, %v1421_v44, %v1417_v58  ;;  %v2276_v4 = vpop.eup %2275  ;;  %v1292_v6 = vadd.f32 %v1291_v62, %v913_v43  ;;  %v1306_v7 = vadd.f32 %v1305_v63, %v914_v49  ;;  %vm1509_vm11 = vcmp.eq.f32.partialorder %v1508_v57, 8.507059e+37 }
 0x448   :  { %1577 = vst [vmem:[#allocation2 + $0x18] sm:$0xff] %v1422_v0  ;;  %v1492_v8 = vsel %vm1491_vm9, %v2272_v38, %v1488_v1  ;;  %v1503_v9 = vadd.f32 %v2274_v46, %v1502_v2  ;;  %v1470_v11 = vmul.f32 %v2276_v4, %v3101_v41  ;;  %v2278_v13 = vpop.eup %2277  ;;  %v1511_v16 = vor.u32 1.1754944e-38, %v1510_v56 }
 0x449   :  { %v1497_v10 = vsel %vm3109_vm5, %v1496_v5, %v1492_v8  ;;  %v2107_v15 = vmul.f32 -1.442695, %v1276_v3  ;;  %v2115_v17 = vmul.f32 -1.442695, %v1292_v6  ;;  %v3138_v19 = vadd.f32 1.0, %v2278_v13  ;;  %v2280_v20 = vpop.eup %2279 }
 0x44a   :  { %1582 = vst [vmem:[#allocation2 + $0x40] sm:$0xff] %v1497_v10  ;;  %v1507_v43 = vsel %vm1506_vm12, %v2274_v46, %v1503_v9  ;;  %v1471_v18 = vsub.f32 1.0, %v1470_v11  ;;  %v2116_v49 = vmul.f32 -1.442695, %v1306_v7  ;;  %v1480_v22 = vand.u32 2147483648, %v3101_v41  ;;  %v2282_v24 = vpop.eup %2281 }
 0x44b   :  { %v1512_v21 = vsel %vm1509_vm11, %v1511_v16, %v1507_v43  ;;  %2283 = vpow2.f32 %v2107_v15  ;;  %v1278_v23 = vadd.f32 %v1277_v12, %v912_v59  ;;  %vm1475_vm13 = vweird.f32 %v2276_v4 }
 0x44c   :  { %1583 = vst [vmem:[#allocation2 + $0x48] sm:$0xff] %v1512_v21  ;;  %v1472_v25 = vmul.f32 %v2276_v4, %v1471_v18  ;;  %v1478_v26 = vand.u32 2147483647, %v3101_v41  ;;  %2285 = vrcp.f32 %v3138_v19  ;;  %v3145_v27 = vadd.f32 1.0, %v2280_v20 }
 0x44d   :  { %v3147_v28 = vadd.f32 1.0, %v2282_v24  ;;  %2287 = vpow2.f32 %v2115_v17  ;;  %vm1474_vm14 = vweird.f32 %v3101_v41  ;;  %v1481_v14 = vor.u32 1.1754944e-38, %v1480_v22 }
 0x44e   :  { %v1473_v29 = vadd.f32 %v2276_v4, %v1472_v25  ;;  %2289 = vpow2.f32 %v2116_v49  ;;  %vm1476_vm15 = vmor %vm1474_vm14, %vm1475_vm13  ;;  %v2114_v59 = vmul.f32 -1.442695, %v1278_v23  ;;  %vm1479_vm1 = vcmp.eq.f32.partialorder %v1478_v26, 8.507059e+37 }
 0x44f   :  { %2291 = vrcp.f32 %v3145_v27  ;;  %v1523_v34 = vand.u32 2147483647, %v3138_v19  ;;  %v1525_v35 = vand.u32 2147483648, %v3138_v19  ;;  %vm1519_vm2 = vweird.f32 %v3138_v19 }
 0x450   :  { %v1477_v30 = vsel %vm1476_vm15, %v2276_v4, %v1473_v29  ;;  %2293 = vrcp.f32 %v3147_v28  ;;  %v1448_v42 = vand.u32 2147483647, %v3145_v27  ;;  %v1450_v51 = vand.u32 2147483648, %v3145_v27 }
 0x451   :  { %v2284_v31 = vpop.eup %2283  ;;  %v1482_v32 = vsel %vm1479_vm1, %v1481_v14, %v1477_v30  ;;  %2295 = vpow2.f32 %v2114_v59  ;;  %vm3164_vm3 = vcmp.eq.f32.partialorder %v1523_v34, 8.507059e+37  ;;  %v1526_v48 = vor.u32 1.1754944e-38, %v1525_v35 }
 0x452   :  { %v2286_v33 = vpop.eup %2285  ;;  %1581 = vst [vmem:[#allocation2 + $0x38] sm:$0xff] %v1482_v32  ;;  %v3154_v36 = vadd.f32 1.0, %v2284_v31  ;;  %vm1444_vm5 = vweird.f32 %v3145_v27  ;;  %vm1459_vm6 = vweird.f32 %v3147_v28  ;;  %v1463_v57 = vand.u32 2147483647, %v3147_v28 }
 0x453   :  { %v2288_v37 = vpop.eup %2287  ;;  %v1515_v38 = vmul.f32 %v2286_v33, %v3138_v19  ;;  %vm1520_vm4 = vweird.f32 %v2286_v33  ;;  %vm3175_vm7 = vcmp.eq.f32.partialorder %v1448_v42, 8.507059e+37  ;;  %v1451_v0 = vor.u32 1.1754944e-38, %v1450_v51 }
 0x454   :  { %v2290_v39 = vpop.eup %2289  ;;  %2297 = vrcp.f32 %v3154_v36  ;;  %v3160_v44 = vadd.f32 1.0, %v2288_v37  ;;  %vm1521_vm8 = vmor %vm1519_vm2, %vm1520_vm4  ;;  %v1465_v56 = vand.u32 2147483648, %v3147_v28  ;;  %vm3186_vm11 = vcmp.eq.f32.partialorder %v1463_v57, 8.507059e+37 }
 0x455   :  { %v2292_v40 = vpop.eup %2291  ;;  %v1516_v41 = vsub.f32 1.0, %v1515_v38  ;;  %v3162_v45 = vadd.f32 1.0, %v2290_v39  ;;  %v1433_v7 = vand.u32 2147483647, %v3154_v36  ;;  %v1435_v12 = vand.u32 2147483648, %v3154_v36 }
 0x456   :  { %v2294_v46 = vpop.eup %2293  ;;  %v1440_v50 = vmul.f32 %v2292_v40, %v3145_v27  ;;  %2299 = vrcp.f32 %v3160_v44  ;;  %vm1445_vm9 = vweird.f32 %v2292_v40  ;;  %v1466_v16 = vor.u32 1.1754944e-38, %v1465_v56 }
 0x457   :  { %v1517_v52 = vmul.f32 %v2286_v33, %v1516_v41  ;;  %v1455_v54 = vmul.f32 %v2294_v46, %v3147_v28  ;;  %v2296_v53 = vpop.eup %2295  ;;  %2301 = vrcp.f32 %v3162_v45  ;;  %vm1460_vm10 = vweird.f32 %v2294_v46  ;;  %vm1446_vm12 = vmor %vm1444_vm5, %vm1445_vm9 }
 0x458   :  { %v1441_v55 = vsub.f32 1.0, %v1440_v50  ;;  %v3194_v13 = vadd.f32 1.0, %v2296_v53  ;;  %vm1461_vm13 = vmor %vm1459_vm6, %vm1460_vm10  ;;  %vm1429_vm15 = vweird.f32 %v3154_v36  ;;  %vm1434_vm1 = vcmp.eq.f32.partialorder %v1433_v7, 8.507059e+37 }
 0x459   :  { %v1518_v58 = vadd.f32 %v2286_v33, %v1517_v52  ;;  %v1456_v61 = vsub.f32 1.0, %v1455_v54  ;;  %v1436_v23 = vor.u32 1.1754944e-38, %v1435_v12  ;;  %v1555_v24 = vand.u32 2147483648, %v3160_v44 }
 0x45a   :  { %v2298_v62 = vpop.eup %2297  ;;  %v1442_v63 = vmul.f32 %v2292_v40, %v1441_v55  ;;  %2303 = vrcp.f32 %v3194_v13  ;;  %v1553_v26 = vand.u32 2147483647, %v3160_v44  ;;  %vm1549_vm4 = vweird.f32 %v3160_v44 }
 0x45b   :  { %v1522_v1 = vsel %vm1521_vm8, %v2286_v33, %v1518_v58  ;;  %v1457_v2 = vmul.f32 %v2294_v46, %v1456_v61  ;;  %v1425_v3 = vmul.f32 %v2298_v62, %v3154_v36  ;;  %vm1430_vm14 = vweird.f32 %v2298_v62 }
 0x45c   :  { %v1527_v4 = vsel %vm3164_vm3, %v1526_v48, %v1522_v1  ;;  %v1443_v5 = vadd.f32 %v2292_v40, %v1442_v63  ;;  %v2300_v8 = vpop.eup %2299  ;;  %vm1431_vm2 = vmor %vm1429_vm15, %vm1430_vm14  ;;  %v1568_v29 = vand.u32 2147483647, %v3162_v45  ;;  %v1570_v14 = vand.u32 2147483648, %v3162_v45 }
 0x45d   :  { %1584 = vst [vmem:[#allocation2 + $0x50] sm:$0xff] %v1527_v4  ;;  %v1458_v9 = vadd.f32 %v2294_v46, %v1457_v2  ;;  %v1426_v11 = vsub.f32 1.0, %v1425_v3  ;;  %v1545_v15 = vmul.f32 %v2300_v8, %v3160_v44  ;;  %v2302_v17 = vpop.eup %2301  ;;  %vm1550_vm3 = vweird.f32 %v2300_v8 }
 0x45e   :  { %v1447_v10 = vsel %vm1446_vm12, %v2292_v40, %v1443_v5  ;;  %v1560_v21 = vmul.f32 %v2302_v17, %v3162_v45  ;;  %vm1565_vm5 = vweird.f32 %v2302_v17  ;;  %vm1551_vm6 = vmor %vm1549_vm4, %vm1550_vm3  ;;  %v1556_v33 = vor.u32 1.1754944e-38, %v1555_v24 }
 0x45f   :  { %v1452_v43 = vsel %vm3175_vm7, %v1451_v0, %v1447_v10  ;;  %v1462_v18 = vsel %vm1461_vm13, %v2294_v46, %v1458_v9  ;;  %v1427_v19 = vmul.f32 %v2298_v62, %v1426_v11  ;;  %v1546_v20 = vsub.f32 1.0, %v1545_v15 }
 0x460   :  { %1579 = vst [vmem:[#allocation2 + $0x28] sm:$0xff] %v1452_v43  ;;  %v1467_v49 = vsel %vm3186_vm11, %v1466_v16, %v1462_v18  ;;  %v1561_v27 = vsub.f32 1.0, %v1560_v21  ;;  %v2304_v32 = vpop.eup %2303  ;;  %vm1564_vm7 = vweird.f32 %v3162_v45  ;;  %vm1554_vm8 = vcmp.eq.f32.partialorder %v1553_v26, 8.507059e+37 }
 0x461   :  { %1580 = vst.msk [vmem:[#allocation2 + $0x30] sm:$0xff] %vm469_vm0, %v1467_v49  ;;  %v1428_v22 = vadd.f32 %v2298_v62, %v1427_v19  ;;  %v1547_v25 = vmul.f32 %v2300_v8, %v1546_v20  ;;  %v1530_v36 = vmul.f32 %v2304_v32, %v3194_v13  ;;  %vm1566_vm9 = vmor %vm1564_vm7, %vm1565_vm5  ;;  %v1571_v38 = vor.u32 1.1754944e-38, %v1570_v14 }
 0x462   :  { %v1562_v31 = vmul.f32 %v2302_v17, %v1561_v27  ;;  %vm1569_vm10 = vcmp.eq.f32.partialorder %v1568_v29, 8.507059e+37  ;;  %v1540_v42 = vand.u32 2147483648, %v3194_v13  ;;  %vm1535_vm11 = vweird.f32 %v2304_v32 }
 0x463   :  { %v1432_v28 = vsel %vm1431_vm2, %v2298_v62, %v1428_v22  ;;  %v1548_v30 = vadd.f32 %v2300_v8, %v1547_v25  ;;  %v1531_v40 = vsub.f32 1.0, %v1530_v36  ;;  %v1538_v45 = vand.u32 2147483647, %v3194_v13 }
 0x464   :  { %v1437_v59 = vsel %vm1434_vm1, %v1436_v23, %v1432_v28  ;;  %v1563_v35 = vadd.f32 %v2302_v17, %v1562_v31  ;;  %vm1534_vm12 = vweird.f32 %v3194_v13  ;;  %v1541_v47 = vor.u32 1.1754944e-38, %v1540_v42 }
 0x465   :  { %1578 = vst [vmem:[#allocation2 + $0x20] sm:$0xff] %v1437_v59  ;;  %v1552_v34 = vsel %vm1551_vm6, %v2300_v8, %v1548_v30  ;;  %v1532_v44 = vmul.f32 %v2304_v32, %v1531_v40  ;;  %vm1536_vm13 = vmor %vm1534_vm12, %vm1535_vm11  ;;  %vm1539_vm14 = vcmp.eq.f32.partialorder %v1538_v45, 8.507059e+37 }
 0x466   :  { %v1557_v37 = vsel %vm1554_vm8, %v1556_v33, %v1552_v34  ;;  %v1567_v39 = vsel %vm1566_vm9, %v2302_v17, %v1563_v35 }
 0x467   :  { %1586 = vst [vmem:[#allocation2 + $0x60] sm:$0xff] %v1557_v37  ;;  %v1572_v41 = vsel %vm1569_vm10, %v1571_v38, %v1567_v39  ;;  %v1533_v46 = vadd.f32 %v2304_v32, %v1532_v44 }
 0x468   :  { %1587 = vst.msk [vmem:[#allocation2 + $0x68] sm:$0xff] %vm469_vm0, %v1572_v41 }
 0x469   :  { %v1537_v48 = vsel %vm1536_vm13, %v2304_v32, %v1533_v46 }
 0x46a   :  { %v1542_v50 = vsel %vm1539_vm14, %v1541_v47, %v1537_v48 }
 0x46b   :  { %1585 = vst [vmem:[#allocation2 + $0x58] sm:$0xff] %v1542_v50 }
 0x46c   :  { %1600 = dma.vmem_to_hbm [thread:$0]  %s1593_s14, 1792, %s1595_s10, [#allocation3], %s2332_s9, %s2332_s9, %s2333_s24  }
 0x46d   :  { %2329 = dma.done.wait [#allocation3], 1792  }
 0x46e   :  { %2330 = vsyncadd [#allocation3], 4294965504 }
 0x46f   :  { %1605 = vsyncpa [#allocation3], 1 }

</bundles_post_ra>
